<compile_context>
chip_gen: v5e
topology: v5e:2x2
jax: 0.10.0
libtpu: 0.0.40
codegen_flags: <defaults>
</compile_context>

<pallas_src>
import jax
import jax.numpy as jnp
from jax import lax
from jax.experimental import pallas as pl
from jax.experimental.pallas import tpu as pltpu


def _round_up(x, m):
    return (x + m - 1) // m * m


def _leaky_relu(x, slope=0.2):
    return jnp.where(x > 0, x, slope * x)


def _choose_batch_tile(batch, requested):
    """Batch tile: multiple of 128 (batch lives on lanes), >=2 grid steps when possible."""
    bt = max(128, _round_up(requested, 128))
    b128 = max(128, _round_up(batch, 128))
    bt = min(bt, b128)
    # v7x has 2 TensorCores; "parallel" grid axes only help with >= 2 steps.
    if b128 >= 256:
        while bt > 128 and _round_up(batch, bt) // bt < 2:
            bt -= 128
    return bt


def discriminator_kernel(x_ref,
                         w1_ref, b1_ref,
                         w2_ref, b2_ref,
                         w3_ref, b3_ref,
                         w4_ref, b4_ref,
                         out_ref):
    """Fused 4-layer MLP forward on one batch tile (batch on the lane axis)."""
    # Layer 1: contract x's feature axis (dim 1) with w1's `in` axis (dim 1).
    # w1 is (d1p, d0), x tile is (bt, d0)  ->  result (d1p, bt): features on
    # sublanes, batch on lanes.  The MXU does the contraction directly; no
    # wrapper-side transpose / extra HBM pass over x is needed.
    h = lax.dot_general(
        w1_ref[...], x_ref[...],
        dimension_numbers=(((1,), (1,)), ((), ())),
        preferred_element_type=jnp.float32) + b1_ref[...]
    h = _leaky_relu(h)                                           # (d1p, bt) f32

    h = jnp.dot(w2_ref[...], h.astype(w2_ref.dtype),
                preferred_element_type=jnp.float32) + b2_ref[...]
    h = _leaky_relu(h)                                           # (d2p, bt)

    h = jnp.dot(w3_ref[...], h.astype(w3_ref.dtype),
                preferred_element_type=jnp.float32) + b3_ref[...]
    h = _leaky_relu(h)                                           # (d3p, bt)

    # Final Linear(hidden, 1): elementwise multiply + cross-sublane reduce
    # (VPU/XLU) instead of an MXU matmul with a single output column.
    # Result (1, bt) is lane-dense -> unmasked store.
    out = jnp.sum(h * w4_ref[...], axis=0, keepdims=True) + b4_ref[...]
    out_ref[...] = out.astype(out_ref.dtype)


def pad_discriminator_params(params, compute_dtype=jnp.bfloat16):
    """Pad/cast PyTorch-layout params ONCE (hoisted out of the per-call forward).

    params: dict of PyTorch-layout weights W (out, in) and biases b (out,).
    compute_dtype: matmul input dtype for x and w1-w3 (f32 accumulation).
                   bf16 (default) trades ~1e-2 relative error for MXU peak.
    Padded hidden units get zero weight and zero bias, so they stay exactly 0
    through LeakyReLU and contribute nothing downstream.
    """
    w1, b1 = params["w1"], params["b1"]   # (4h, im_dim), (4h,)
    w2, b2 = params["w2"], params["b2"]   # (2h, 4h),     (2h,)
    w3, b3 = params["w3"], params["b3"]   # (h, 2h),      (h,)
    w4, b4 = params["w4"], params["b4"]   # (1, h),       (1,)

    d1, d0 = w1.shape
    d2 = w2.shape[0]
    d3 = w3.shape[0]
    d1p, d2p, d3p = (_round_up(d, 128) for d in (d1, d2, d3))

    return {
        # Feature (`in`) axis of w1 stays at the natural, unpadded im_dim.
        "w1": jnp.zeros((d1p, d0), compute_dtype).at[:d1, :].set(w1.astype(compute_dtype)),
        "w2": jnp.zeros((d2p, d1p), compute_dtype).at[:d2, :d1].set(w2.astype(compute_dtype)),
        "w3": jnp.zeros((d3p, d2p), compute_dtype).at[:d3, :d2].set(w3.astype(compute_dtype)),
        "w4": jnp.zeros((d3p, 1), jnp.float32).at[:d3, 0].set(w4[0].astype(jnp.float32)),
        "b1": jnp.zeros((d1p, 1), jnp.float32).at[:d1, 0].set(b1.astype(jnp.float32)),
        "b2": jnp.zeros((d2p, 1), jnp.float32).at[:d2, 0].set(b2.astype(jnp.float32)),
        "b3": jnp.zeros((d3p, 1), jnp.float32).at[:d3, 0].set(b3.astype(jnp.float32)),
        "b4": b4.reshape(1, 1).astype(jnp.float32),
        "dims": (int(d0), int(d1), int(d2), int(d3)),
    }


def discriminator_forward(x, padded_params, *, batch_tile=512):
    """x: (B, im_dim). padded_params: output of pad_discriminator_params. Returns (B, 1) f32."""
    pp = padded_params
    d0, d1, d2, d3 = pp["dims"]
    w1p, b1p = pp["w1"], pp["b1"]
    w2p, b2p = pp["w2"], pp["b2"]
    w3p, b3p = pp["w3"], pp["b3"]
    w4p, b4p = pp["w4"], pp["b4"]
    d1p, d2p, d3p = w1p.shape[0], w2p.shape[0], w3p.shape[0]
    compute_dtype = w1p.dtype
    itemsize = jnp.dtype(compute_dtype).itemsize

    B, im_dim = x.shape
    assert im_dim == d0, f"x feature dim {im_dim} != param in dim {d0}"

    bt = _choose_batch_tile(B, batch_tile)
    Bp = _round_up(B, bt)
    grid = (Bp // bt,)

    # Only batch padding remains in the wrapper (cheap); x keeps its natural
    # (B, im_dim) layout — no host-side transpose / feature pad / extra HBM pass.
    xp = x.astype(compute_dtype)
    if Bp != B:
        xp = jnp.pad(xp, ((0, Bp - B), (0, 0)))

    weight_bytes = ((w1p.size + w2p.size + w3p.size) * itemsize
                    + (w4p.size + b1p.size + b2p.size + b3p.size + b4p.size) * 4)

    cost = pl.CostEstimate(
        flops=int(2 * B * (d0 * d1 + d1 * d2 + d2 * d3 + d3)),
        transcendentals=0,
        bytes_accessed=int(B * d0 * itemsize      # x read once
                           + weight_bytes         # one pass over the weights
                           + B * 4),              # output write
    )

    def run(single_buffer_weights):
        def const_spec(arr):
            # Grid-invariant blocks: index_map is constant, nothing to prefetch.
            if single_buffer_weights:
                return pl.BlockSpec(arr.shape, lambda i: (0, 0),
                                    pipeline_mode=pl.Buffered(1))
            return pl.BlockSpec(arr.shape, lambda i: (0, 0))

        wbuf = 1 if single_buffer_weights else 2
        x_tile_bytes = bt * d0 * itemsize
        act_bytes = (d1p + d2p + d3p) * bt * 4          # live f32 activations
        est = (2 * x_tile_bytes                          # double-buffered x tile
               + x_tile_bytes                            # in-kernel transposed copy
               + wbuf * weight_bytes
               + act_bytes
               + 2 * bt * 4)                             # double-buffered (1, bt) out
        # Realistic limit (2x headroom), small floor, never above v7x physical.
        vmem_limit = int(min(max(2 * est, 8 * 1024 * 1024), 64 * 1024 * 1024))

        return pl.pallas_call(
            discriminator_kernel,
            out_shape=jax.ShapeDtypeStruct((1, Bp), jnp.float32),
            grid_spec=pltpu.PrefetchScalarGridSpec(
                num_scalar_prefetch=0,
                grid=grid,
                in_specs=[
                    pl.BlockSpec((bt, d0), lambda i: (i, 0)),   # natural-layout x tile
                    const_spec(w1p), const_spec(b1p),
                    const_spec(w2p), const_spec(b2p),
                    const_spec(w3p), const_spec(b3p),
                    const_spec(w4p), const_spec(b4p),
                ],
                out_specs=pl.BlockSpec((1, bt), lambda i: (0, i)),  # lane-dense
            ),
            compiler_params=pltpu.CompilerParams(
                dimension_semantics=("parallel",),
                vmem_limit_bytes=vmem_limit,
            ),
            cost_estimate=cost,
        )(xp, w1p, b1p, w2p, b2p, w3p, b3p, w4p, b4p)

    try:
        out = run(single_buffer_weights=True)
    except Exception:
        # Fallback if this JAX build rejects Buffered(1) on grid-invariant specs.
        out = run(single_buffer_weights=False)

    # Layout plumbing back to the PyTorch output shape (B, 1).
    return out[0, :B].reshape(B, 1)


def init_discriminator_params(key, im_dim, hidden_dim=128):
    """nn.Linear-style init, stored in PyTorch layout: W (out, in), b (out,)."""
    dims = [im_dim, hidden_dim * 4, hidden_dim * 2, hidden_dim, 1]
    params = {}
    for idx in range(4):
        fan_in, fan_out = dims[idx], dims[idx + 1]
        key, kw, kb = jax.random.split(key, 3)
        bound = 1.0 / jnp.sqrt(jnp.float32(fan_in))
        params[f"w{idx + 1}"] = jax.random.uniform(
            kw, (fan_out, fan_in), jnp.float32, minval=-bound, maxval=bound)
        params[f"b{idx + 1}"] = jax.random.uniform(
            kb, (fan_out,), jnp.float32, minval=-bound, maxval=bound)
    return params


def _reference_forward(x, params):
    h = x
    for idx in range(1, 4):
        h = h @ params[f"w{idx}"].T + params[f"b{idx}"]
        h = jnp.where(h > 0, h, 0.2 * h)
    return h @ params["w4"].T + params["b4"]


if __name__ == "__main__":
    key = jax.random.PRNGKey(0)
    key, kx, kp = jax.random.split(key, 3)

    # Small demo config: layers 32 -> 128 -> 64 -> 32 -> 1.
    batch, im_dim, hidden_dim = 8, 32, 32
    x = jax.random.normal(kx, (batch, im_dim), dtype=jnp.float32)
    params = init_discriminator_params(kp, im_dim, hidden_dim)
    ref = _reference_forward(x, params)

    # f32 compute path (exact), padding hoisted out of the forward call.
    pf32 = pad_discriminator_params(params, compute_dtype=jnp.float32)
    out = jax.block_until_ready(discriminator_forward(x, pf32))
    assert out.shape == (batch, 1)
    assert jnp.allclose(out, ref, atol=1e-3, rtol=1e-3), "f32 mismatch vs reference"

    # Default bf16 matmul-input path (f32 accumulation) — expected precision loss.
    pbf16 = pad_discriminator_params(params)
    out_bf16 = jax.block_until_ready(discriminator_forward(x, pbf16))
    assert jnp.allclose(out_bf16, ref, atol=1e-1, rtol=1e-1), "bf16 path mismatch"

    # Unaligned shapes + multi-tile grid: batch_tile=512 clamps to 128 so the
    # grid keeps 2 parallel steps; exercises batch padding and odd im_dim.
    key, kx2, kp2 = jax.random.split(key, 3)
    x2 = jax.random.normal(kx2, (200, 37), dtype=jnp.float32)
    params2 = init_discriminator_params(kp2, 37, 32)
    p2 = pad_discriminator_params(params2, compute_dtype=jnp.float32)
    out2 = jax.block_until_ready(discriminator_forward(x2, p2, batch_tile=512))
    ref2 = _reference_forward(x2, params2)
    assert out2.shape == (200, 1)
    assert jnp.allclose(out2, ref2, atol=1e-3, rtol=1e-3), "padded-path mismatch"

    # Larger batch: exercises the new default 512-wide tile with a 2-step grid.
    key, kx3, kp3 = jax.random.split(key, 3)
    x3 = jax.random.normal(kx3, (1024, 64), dtype=jnp.float32)
    params3 = init_discriminator_params(kp3, 64, 32)
    p3 = pad_discriminator_params(params3)   # bf16 default
    out3 = jax.block_until_ready(discriminator_forward(x3, p3))
    ref3 = _reference_forward(x3, params3)
    assert out3.shape == (1024, 1)
    assert jnp.allclose(out3, ref3, atol=1e-1, rtol=1e-1), "512-tile bf16 mismatch"

    print("KERNEL_OK")
</pallas_src>

<mosaic_0001>
module attributes {stable_mosaic.version = 11 : i64} {
  func.func @discriminator_kernel(%arg0: i32, %arg1: memref<128x32xf32, #tpu.memory_space<vmem>>, %arg2: memref<128x32xf32, #tpu.memory_space<vmem>>, %arg3: memref<128x1xf32, #tpu.memory_space<vmem>>, %arg4: memref<128x128xf32, #tpu.memory_space<vmem>>, %arg5: memref<128x1xf32, #tpu.memory_space<vmem>>, %arg6: memref<128x128xf32, #tpu.memory_space<vmem>>, %arg7: memref<128x1xf32, #tpu.memory_space<vmem>>, %arg8: memref<128x1xf32, #tpu.memory_space<vmem>>, %arg9: memref<1x1xf32, #tpu.memory_space<vmem>>, %arg10: memref<1x128xf32, #tpu.memory_space<vmem>>) attributes {dimension_semantics = [#tpu.dimension_semantics<parallel>], iteration_bounds = array<i64: 1>, scalar_prefetch = 0 : i64, scratch_operands = 0 : i64, tpu.core_type = #tpu.core_type<tc>, window_params = [{transform_indices = @transform_0, window_bounds = array<i64: 128, 32>}, {pipeline_mode = #tpu.pipeline_mode<synchronous>, transform_indices = @transform_1, window_bounds = array<i64: 128, 32>}, {pipeline_mode = #tpu.pipeline_mode<synchronous>, transform_indices = @transform_2, window_bounds = array<i64: 128, 1>}, {pipeline_mode = #tpu.pipeline_mode<synchronous>, transform_indices = @transform_3, window_bounds = array<i64: 128, 128>}, {pipeline_mode = #tpu.pipeline_mode<synchronous>, transform_indices = @transform_4, window_bounds = array<i64: 128, 1>}, {pipeline_mode = #tpu.pipeline_mode<synchronous>, transform_indices = @transform_5, window_bounds = array<i64: 128, 128>}, {pipeline_mode = #tpu.pipeline_mode<synchronous>, transform_indices = @transform_6, window_bounds = array<i64: 128, 1>}, {pipeline_mode = #tpu.pipeline_mode<synchronous>, transform_indices = @transform_7, window_bounds = array<i64: 128, 1>}, {pipeline_mode = #tpu.pipeline_mode<synchronous>, transform_indices = @transform_8, window_bounds = array<i64: 1, 1>}, {transform_indices = @transform_9, window_bounds = array<i64: 1, 128>}]} {
    %c0 = arith.constant 0 : index
    %c0_0 = arith.constant 0 : index
    %0 = vector.load %arg2[%c0, %c0_0] : memref<128x32xf32, #tpu.memory_space<vmem>>, vector<128x32xf32>
    %c0_1 = arith.constant 0 : index
    %c0_2 = arith.constant 0 : index
    %1 = vector.load %arg1[%c0_1, %c0_2] : memref<128x32xf32, #tpu.memory_space<vmem>>, vector<128x32xf32>
    %cst = arith.constant dense<0.000000e+00> : vector<128x128xf32>
    %2 = tpu.matmul %0, %1, %cst {dimension_numbers = #tpu.dot_dimension_numbers<[1], [1], [0], [0], [0, 0, 1, 0], [], []>} : vector<128x32xf32>, vector<128x32xf32>, vector<128x128xf32> -> vector<128x128xf32>
    %c0_3 = arith.constant 0 : index
    %c0_4 = arith.constant 0 : index
    %3 = vector.load %arg3[%c0_3, %c0_4] : memref<128x1xf32, #tpu.memory_space<vmem>>, vector<128x1xf32>
    %4 = vector.broadcast %3 : vector<128x1xf32> to vector<128x128xf32>
    %5 = arith.addf %2, %4 : vector<128x128xf32>
    %cst_5 = arith.constant 0.000000e+00 : f32
    %6 = vector.broadcast %cst_5 : f32 to vector<128x128xf32>
    %7 = arith.cmpf ogt, %5, %6 : vector<128x128xf32>
    %cst_6 = arith.constant 2.000000e-01 : f32
    %8 = vector.broadcast %cst_6 : f32 to vector<128x128xf32>
    %9 = arith.mulf %8, %5 : vector<128x128xf32>
    %10 = arith.select %7, %5, %9 : vector<128x128xi1>, vector<128x128xf32>
    %c0_7 = arith.constant 0 : index
    %c0_8 = arith.constant 0 : index
    %11 = vector.load %arg4[%c0_7, %c0_8] : memref<128x128xf32, #tpu.memory_space<vmem>>, vector<128x128xf32>
    %cst_9 = arith.constant dense<0.000000e+00> : vector<128x128xf32>
    %12 = tpu.matmul %11, %10, %cst_9 {dimension_numbers = #tpu.dot_dimension_numbers<[1], [0], [0], [1], [0, 0, 1, 1], [], []>} : vector<128x128xf32>, vector<128x128xf32>, vector<128x128xf32> -> vector<128x128xf32>
    %c0_10 = arith.constant 0 : index
    %c0_11 = arith.constant 0 : index
    %13 = vector.load %arg5[%c0_10, %c0_11] : memref<128x1xf32, #tpu.memory_space<vmem>>, vector<128x1xf32>
    %14 = vector.broadcast %13 : vector<128x1xf32> to vector<128x128xf32>
    %15 = arith.addf %12, %14 : vector<128x128xf32>
    %cst_12 = arith.constant 0.000000e+00 : f32
    %16 = vector.broadcast %cst_12 : f32 to vector<128x128xf32>
    %17 = arith.cmpf ogt, %15, %16 : vector<128x128xf32>
    %cst_13 = arith.constant 2.000000e-01 : f32
    %18 = vector.broadcast %cst_13 : f32 to vector<128x128xf32>
    %19 = arith.mulf %18, %15 : vector<128x128xf32>
    %20 = arith.select %17, %15, %19 : vector<128x128xi1>, vector<128x128xf32>
    %c0_14 = arith.constant 0 : index
    %c0_15 = arith.constant 0 : index
    %21 = vector.load %arg6[%c0_14, %c0_15] : memref<128x128xf32, #tpu.memory_space<vmem>>, vector<128x128xf32>
    %cst_16 = arith.constant dense<0.000000e+00> : vector<128x128xf32>
    %22 = tpu.matmul %21, %20, %cst_16 {dimension_numbers = #tpu.dot_dimension_numbers<[1], [0], [0], [1], [0, 0, 1, 1], [], []>} : vector<128x128xf32>, vector<128x128xf32>, vector<128x128xf32> -> vector<128x128xf32>
    %c0_17 = arith.constant 0 : index
    %c0_18 = arith.constant 0 : index
    %23 = vector.load %arg7[%c0_17, %c0_18] : memref<128x1xf32, #tpu.memory_space<vmem>>, vector<128x1xf32>
    %24 = vector.broadcast %23 : vector<128x1xf32> to vector<128x128xf32>
    %25 = arith.addf %22, %24 : vector<128x128xf32>
    %cst_19 = arith.constant 0.000000e+00 : f32
    %26 = vector.broadcast %cst_19 : f32 to vector<128x128xf32>
    %27 = arith.cmpf ogt, %25, %26 : vector<128x128xf32>
    %cst_20 = arith.constant 2.000000e-01 : f32
    %28 = vector.broadcast %cst_20 : f32 to vector<128x128xf32>
    %29 = arith.mulf %28, %25 : vector<128x128xf32>
    %30 = arith.select %27, %25, %29 : vector<128x128xi1>, vector<128x128xf32>
    %c0_21 = arith.constant 0 : index
    %c0_22 = arith.constant 0 : index
    %31 = vector.load %arg8[%c0_21, %c0_22] : memref<128x1xf32, #tpu.memory_space<vmem>>, vector<128x1xf32>
    %32 = vector.broadcast %31 : vector<128x1xf32> to vector<128x128xf32>
    %33 = arith.mulf %30, %32 : vector<128x128xf32>
    %cst_23 = arith.constant dense<0.000000e+00> : vector<128xf32>
    %34 = vector.multi_reduction <add>, %33, %cst_23 [0] : vector<128x128xf32> to vector<128xf32>
    %35 = vector.shape_cast %34 : vector<128xf32> to vector<1x128xf32>
    %c0_24 = arith.constant 0 : index
    %c0_25 = arith.constant 0 : index
    %36 = vector.load %arg9[%c0_24, %c0_25] : memref<1x1xf32, #tpu.memory_space<vmem>>, vector<1x1xf32>
    %37 = vector.broadcast %36 : vector<1x1xf32> to vector<1x128xf32>
    %38 = arith.addf %35, %37 : vector<1x128xf32>
    %c0_26 = arith.constant 0 : index
    %c0_27 = arith.constant 0 : index
    %39 = vector.load %arg10[%c0_26, %c0_27] : memref<1x128xf32, #tpu.memory_space<vmem>>, vector<1x128xf32>
    tpu.vector_store %arg10[%c0_26, %c0_27], %38 {strides = array<i32>} : memref<1x128xf32, #tpu.memory_space<vmem>>, vector<1x128xf32>,
    return
  }
  func.func @transform_0(%arg0: i32) -> (i32, i32) {
    %c0_i32 = arith.constant 0 : i32
    %c0_i32_0 = arith.constant 0 : i32
    return %arg0, %c0_i32 : i32, i32
  }
  func.func @transform_1(%arg0: i32) -> (i32, i32) {
    %c0_i32 = arith.constant 0 : i32
    %c0_i32_0 = arith.constant 0 : i32
    %c0_i32_1 = arith.constant 0 : i32
    return %c0_i32, %c0_i32_0 : i32, i32
  }
  func.func @transform_2(%arg0: i32) -> (i32, i32) {
    %c0_i32 = arith.constant 0 : i32
    %c0_i32_0 = arith.constant 0 : i32
    %c0_i32_1 = arith.constant 0 : i32
    return %c0_i32, %c0_i32_0 : i32, i32
  }
  func.func @transform_3(%arg0: i32) -> (i32, i32) {
    %c0_i32 = arith.constant 0 : i32
    %c0_i32_0 = arith.constant 0 : i32
    %c0_i32_1 = arith.constant 0 : i32
    return %c0_i32, %c0_i32_0 : i32, i32
  }
  func.func @transform_4(%arg0: i32) -> (i32, i32) {
    %c0_i32 = arith.constant 0 : i32
    %c0_i32_0 = arith.constant 0 : i32
    %c0_i32_1 = arith.constant 0 : i32
    return %c0_i32, %c0_i32_0 : i32, i32
  }
  func.func @transform_5(%arg0: i32) -> (i32, i32) {
    %c0_i32 = arith.constant 0 : i32
    %c0_i32_0 = arith.constant 0 : i32
    %c0_i32_1 = arith.constant 0 : i32
    return %c0_i32, %c0_i32_0 : i32, i32
  }
  func.func @transform_6(%arg0: i32) -> (i32, i32) {
    %c0_i32 = arith.constant 0 : i32
    %c0_i32_0 = arith.constant 0 : i32
    %c0_i32_1 = arith.constant 0 : i32
    return %c0_i32, %c0_i32_0 : i32, i32
  }
  func.func @transform_7(%arg0: i32) -> (i32, i32) {
    %c0_i32 = arith.constant 0 : i32
    %c0_i32_0 = arith.constant 0 : i32
    %c0_i32_1 = arith.constant 0 : i32
    return %c0_i32, %c0_i32_0 : i32, i32
  }
  func.func @transform_8(%arg0: i32) -> (i32, i32) {
    %c0_i32 = arith.constant 0 : i32
    %c0_i32_0 = arith.constant 0 : i32
    %c0_i32_1 = arith.constant 0 : i32
    return %c0_i32, %c0_i32_0 : i32, i32
  }
  func.func @transform_9(%arg0: i32) -> (i32, i32) {
    %c0_i32 = arith.constant 0 : i32
    %c0_i32_0 = arith.constant 0 : i32
    return %c0_i32, %arg0 : i32, i32
  }
}

module attributes {stable_mosaic.version = 11 : i64} {
  func.func @discriminator_kernel(%arg0: i32, %arg1: memref<128x32xf32, #tpu.memory_space<vmem>>, %arg2: memref<128x32xf32, #tpu.memory_space<vmem>>, %arg3: memref<128x1xf32, #tpu.memory_space<vmem>>, %arg4: memref<128x128xf32, #tpu.memory_space<vmem>>, %arg5: memref<128x1xf32, #tpu.memory_space<vmem>>, %arg6: memref<128x128xf32, #tpu.memory_space<vmem>>, %arg7: memref<128x1xf32, #tpu.memory_space<vmem>>, %arg8: memref<128x1xf32, #tpu.memory_space<vmem>>, %arg9: memref<1x1xf32, #tpu.memory_space<vmem>>, %arg10: memref<1x128xf32, #tpu.memory_space<vmem>>) attributes {dimension_semantics = [#tpu.dimension_semantics<parallel>], iteration_bounds = array<i64: 1>, scalar_prefetch = 0 : i64, scratch_operands = 0 : i64, tpu.core_type = #tpu.core_type<tc>, window_params = [{transform_indices = @transform_0, window_bounds = array<i64: 128, 32>}, {pipeline_mode = #tpu.pipeline_mode<synchronous>, transform_indices = @transform_1, window_bounds = array<i64: 128, 32>}, {pipeline_mode = #tpu.pipeline_mode<synchronous>, transform_indices = @transform_2, window_bounds = array<i64: 128, 1>}, {pipeline_mode = #tpu.pipeline_mode<synchronous>, transform_indices = @transform_3, window_bounds = array<i64: 128, 128>}, {pipeline_mode = #tpu.pipeline_mode<synchronous>, transform_indices = @transform_4, window_bounds = array<i64: 128, 1>}, {pipeline_mode = #tpu.pipeline_mode<synchronous>, transform_indices = @transform_5, window_bounds = array<i64: 128, 128>}, {pipeline_mode = #tpu.pipeline_mode<synchronous>, transform_indices = @transform_6, window_bounds = array<i64: 128, 1>}, {pipeline_mode = #tpu.pipeline_mode<synchronous>, transform_indices = @transform_7, window_bounds = array<i64: 128, 1>}, {pipeline_mode = #tpu.pipeline_mode<synchronous>, transform_indices = @transform_8, window_bounds = array<i64: 1, 1>}, {transform_indices = @transform_9, window_bounds = array<i64: 1, 128>}]} {
    %c0 = arith.constant 0 : index
    %c0_0 = arith.constant 0 : index
    %0 = vector.load %arg2[%c0, %c0_0] : memref<128x32xf32, #tpu.memory_space<vmem>>, vector<128x32xf32>
    %c0_1 = arith.constant 0 : index
    %c0_2 = arith.constant 0 : index
    %1 = vector.load %arg1[%c0_1, %c0_2] : memref<128x32xf32, #tpu.memory_space<vmem>>, vector<128x32xf32>
    %cst = arith.constant dense<0.000000e+00> : vector<128x128xf32>
    %2 = tpu.matmul %0, %1, %cst {dimension_numbers = #tpu.dot_dimension_numbers<[1], [1], [0], [0], [0, 0, 1, 0], [], []>} : vector<128x32xf32>, vector<128x32xf32>, vector<128x128xf32> -> vector<128x128xf32>
    %c0_3 = arith.constant 0 : index
    %c0_4 = arith.constant 0 : index
    %3 = vector.load %arg3[%c0_3, %c0_4] : memref<128x1xf32, #tpu.memory_space<vmem>>, vector<128x1xf32>
    %4 = vector.broadcast %3 : vector<128x1xf32> to vector<128x128xf32>
    %5 = arith.addf %2, %4 : vector<128x128xf32>
    %cst_5 = arith.constant 0.000000e+00 : f32
    %6 = vector.broadcast %cst_5 : f32 to vector<128x128xf32>
    %7 = arith.cmpf ogt, %5, %6 : vector<128x128xf32>
    %cst_6 = arith.constant 2.000000e-01 : f32
    %8 = vector.broadcast %cst_6 : f32 to vector<128x128xf32>
    %9 = arith.mulf %8, %5 : vector<128x128xf32>
    %10 = arith.select %7, %5, %9 : vector<128x128xi1>, vector<128x128xf32>
    %c0_7 = arith.constant 0 : index
    %c0_8 = arith.constant 0 : index
    %11 = vector.load %arg4[%c0_7, %c0_8] : memref<128x128xf32, #tpu.memory_space<vmem>>, vector<128x128xf32>
    %cst_9 = arith.constant dense<0.000000e+00> : vector<128x128xf32>
    %12 = tpu.matmul %11, %10, %cst_9 {dimension_numbers = #tpu.dot_dimension_numbers<[1], [0], [0], [1], [0, 0, 1, 1], [], []>} : vector<128x128xf32>, vector<128x128xf32>, vector<128x128xf32> -> vector<128x128xf32>
    %c0_10 = arith.constant 0 : index
    %c0_11 = arith.constant 0 : index
    %13 = vector.load %arg5[%c0_10, %c0_11] : memref<128x1xf32, #tpu.memory_space<vmem>>, vector<128x1xf32>
    %14 = vector.broadcast %13 : vector<128x1xf32> to vector<128x128xf32>
    %15 = arith.addf %12, %14 : vector<128x128xf32>
    %cst_12 = arith.constant 0.000000e+00 : f32
    %16 = vector.broadcast %cst_12 : f32 to vector<128x128xf32>
    %17 = arith.cmpf ogt, %15, %16 : vector<128x128xf32>
    %cst_13 = arith.constant 2.000000e-01 : f32
    %18 = vector.broadcast %cst_13 : f32 to vector<128x128xf32>
    %19 = arith.mulf %18, %15 : vector<128x128xf32>
    %20 = arith.select %17, %15, %19 : vector<128x128xi1>, vector<128x128xf32>
    %c0_14 = arith.constant 0 : index
    %c0_15 = arith.constant 0 : index
    %21 = vector.load %arg6[%c0_14, %c0_15] : memref<128x128xf32, #tpu.memory_space<vmem>>, vector<128x128xf32>
    %cst_16 = arith.constant dense<0.000000e+00> : vector<128x128xf32>
    %22 = tpu.matmul %21, %20, %cst_16 {dimension_numbers = #tpu.dot_dimension_numbers<[1], [0], [0], [1], [0, 0, 1, 1], [], []>} : vector<128x128xf32>, vector<128x128xf32>, vector<128x128xf32> -> vector<128x128xf32>
    %c0_17 = arith.constant 0 : index
    %c0_18 = arith.constant 0 : index
    %23 = vector.load %arg7[%c0_17, %c0_18] : memref<128x1xf32, #tpu.memory_space<vmem>>, vector<128x1xf32>
    %24 = vector.broadcast %23 : vector<128x1xf32> to vector<128x128xf32>
    %25 = arith.addf %22, %24 : vector<128x128xf32>
    %cst_19 = arith.constant 0.000000e+00 : f32
    %26 = vector.broadcast %cst_19 : f32 to vector<128x128xf32>
    %27 = arith.cmpf ogt, %25, %26 : vector<128x128xf32>
    %cst_20 = arith.constant 2.000000e-01 : f32
    %28 = vector.broadcast %cst_20 : f32 to vector<128x128xf32>
    %29 = arith.mulf %28, %25 : vector<128x128xf32>
    %30 = arith.select %27, %25, %29 : vector<128x128xi1>, vector<128x128xf32>
    %c0_21 = arith.constant 0 : index
    %c0_22 = arith.constant 0 : index
    %31 = vector.load %arg8[%c0_21, %c0_22] : memref<128x1xf32, #tpu.memory_space<vmem>>, vector<128x1xf32>
    %32 = vector.broadcast %31 : vector<128x1xf32> to vector<128x128xf32>
    %33 = arith.mulf %30, %32 : vector<128x128xf32>
    %cst_23 = arith.constant dense<0.000000e+00> : vector<128xf32>
    %34 = vector.multi_reduction <add>, %33, %cst_23 [0] : vector<128x128xf32> to vector<128xf32>
    %35 = vector.shape_cast %34 : vector<128xf32> to vector<1x128xf32>
    %c0_24 = arith.constant 0 : index
    %c0_25 = arith.constant 0 : index
    %36 = vector.load %arg9[%c0_24, %c0_25] : memref<1x1xf32, #tpu.memory_space<vmem>>, vector<1x1xf32>
    %37 = vector.broadcast %36 : vector<1x1xf32> to vector<1x128xf32>
    %38 = arith.addf %35, %37 : vector<1x128xf32>
    %c0_26 = arith.constant 0 : index
    %c0_27 = arith.constant 0 : index
    %39 = vector.load %arg10[%c0_26, %c0_27] : memref<1x128xf32, #tpu.memory_space<vmem>>, vector<1x128xf32>
    tpu.vector_store %arg10[%c0_26, %c0_27], %38 {strides = array<i32>} : memref<1x128xf32, #tpu.memory_space<vmem>>, vector<1x128xf32>,
    return
  }
  func.func @transform_0(%arg0: i32) -> (i32, i32) {
    %c0_i32 = arith.constant 0 : i32
    %c0_i32_0 = arith.constant 0 : i32
    return %arg0, %c0_i32 : i32, i32
  }
  func.func @transform_1(%arg0: i32) -> (i32, i32) {
    %c0_i32 = arith.constant 0 : i32
    %c0_i32_0 = arith.constant 0 : i32
    %c0_i32_1 = arith.constant 0 : i32
    return %c0_i32, %c0_i32_0 : i32, i32
  }
  func.func @transform_2(%arg0: i32) -> (i32, i32) {
    %c0_i32 = arith.constant 0 : i32
    %c0_i32_0 = arith.constant 0 : i32
    %c0_i32_1 = arith.constant 0 : i32
    return %c0_i32, %c0_i32_0 : i32, i32
  }
  func.func @transform_3(%arg0: i32) -> (i32, i32) {
    %c0_i32 = arith.constant 0 : i32
    %c0_i32_0 = arith.constant 0 : i32
    %c0_i32_1 = arith.constant 0 : i32
    return %c0_i32, %c0_i32_0 : i32, i32
  }
  func.func @transform_4(%arg0: i32) -> (i32, i32) {
    %c0_i32 = arith.constant 0 : i32
    %c0_i32_0 = arith.constant 0 : i32
    %c0_i32_1 = arith.constant 0 : i32
    return %c0_i32, %c0_i32_0 : i32, i32
  }
  func.func @transform_5(%arg0: i32) -> (i32, i32) {
    %c0_i32 = arith.constant 0 : i32
    %c0_i32_0 = arith.constant 0 : i32
    %c0_i32_1 = arith.constant 0 : i32
    return %c0_i32, %c0_i32_0 : i32, i32
  }
  func.func @transform_6(%arg0: i32) -> (i32, i32) {
    %c0_i32 = arith.constant 0 : i32
    %c0_i32_0 = arith.constant 0 : i32
    %c0_i32_1 = arith.constant 0 : i32
    return %c0_i32, %c0_i32_0 : i32, i32
  }
  func.func @transform_7(%arg0: i32) -> (i32, i32) {
    %c0_i32 = arith.constant 0 : i32
    %c0_i32_0 = arith.constant 0 : i32
    %c0_i32_1 = arith.constant 0 : i32
    return %c0_i32, %c0_i32_0 : i32, i32
  }
  func.func @transform_8(%arg0: i32) -> (i32, i32) {
    %c0_i32 = arith.constant 0 : i32
    %c0_i32_0 = arith.constant 0 : i32
    %c0_i32_1 = arith.constant 0 : i32
    return %c0_i32, %c0_i32_0 : i32, i32
  }
  func.func @transform_9(%arg0: i32) -> (i32, i32) {
    %c0_i32 = arith.constant 0 : i32
    %c0_i32_0 = arith.constant 0 : i32
    return %c0_i32, %arg0 : i32, i32
  }
}

</mosaic_0001>

<bundles_post_ra>
// kernel: tpu_custom_call.1
= control target key start
LH: loop header
LB: loop body
LE: loop exit
PB: predicated region body
PF: predicated region fallthrough
CT: control target
= control target key end

     0   :  { %s1630_s0 = inlined_call_operand.vmem [shape: f32[128,32], index: 0, kind: input, shape index: {}]   ;;  %s1631_s1 = inlined_call_operand.vmem [shape: f32[128,32], index: 1, kind: input, shape index: {}]   ;;  %s1632_s2 = inlined_call_operand.vmem [shape: f32[128,1], index: 2, kind: input, shape index: {}]   ;;  %s1633_s3 = inlined_call_operand.vmem [shape: f32[128,128], index: 3, kind: input, shape index: {}]   ;;  %s1634_s4 = inlined_call_operand.vmem [shape: f32[128,1], index: 4, kind: input, shape index: {}]   ;;  %s1635_s5 = inlined_call_operand.vmem [shape: f32[128,128], index: 5, kind: input, shape index: {}]   ;;  %s1636_s6 = inlined_call_operand.vmem [shape: f32[128,1], index: 6, kind: input, shape index: {}]   ;;  %s1637_s7 = inlined_call_operand.vmem [shape: f32[128,1], index: 7, kind: input, shape index: {}]   ;;  %s1638_s8 = inlined_call_operand.<no memory space> [shape: f32[1,1], index: 8, kind: input, shape index: {}]   ;;  %s1639_s9 = inlined_call_operand.hbm [shape: f32[1,128], index: 9, kind: output, shape index: {}]  }
   0x1   :  { %v14_v0 = vstv %s1638_s8 }
   0x2   :  { %15 = vst [vmem:[#allocation2] sm:$0x1] %v14_v0 }
   0x3   :  { %v66_v1 = vld [vmem:[%s1630_s0 + $0x78] sm:$0xff]  ;;  %vm163_vm0 = vcmask 261120   ;;  %v1092_v3 = vmov 0   ;;  %v80_v4 = vld [vmem:[%s1632_s2 + $0x68] sm:$0xff]  ;;  %v65_v6 = vld [vmem:[%s1630_s0 + $0x70] sm:$0xff] }
   0x4   :  { %v82_v2 = vld [vmem:[%s1632_s2 + $0x78] sm:$0xff]  ;;  %1065 = vset.pattern.permute.xlu2 %v1092_v3  ;;  %1064 = vset.pattern.permute.xlu1 %v1092_v3  ;;  %v64_v7 = vld [vmem:[%s1630_s0 + $0x68] sm:$0xff]  ;;  %v81_v8 = vld [vmem:[%s1632_s2 + $0x70] sm:$0xff] }
   0x5   :  { %v78_v5 = vld [vmem:[%s1632_s2 + $0x58] sm:$0xff]  ;;  %1063 = vset.pattern.permute.xlu0 %v1092_v3  ;;  %981 = vmatpush.xpose.msk.msra.mxu0 %vm163_vm0, %v66_v1 }
   0x6   :  { %1013 = vmatpush.xpose.msk.msra.mxu3 %vm163_vm0, %v66_v1  ;;  %160 = vperm.xlu0 %1063, %v82_v2  }
   0x7   :  { %150 = vperm.xlu1 %1064, %v80_v4   ;;  %140 = vperm.xlu2 %1065, %v78_v5  }
   0x9   :  { %982 = vmatpush.xpose.msk.msra.mxu0 %vm163_vm0, %v65_v6 }
   0xa   :  { %1014 = vmatpush.xpose.msk.msra.mxu3 %vm163_vm0, %v65_v6 }
   0xb   :  { %16 = vsyncpa [#allocation4], 0  ;;  %v79_v9 = vld [vmem:[%s1632_s2 + $0x60] sm:$0xff]  ;;  %v77_v10 = vld [vmem:[%s1632_s2 + $0x50] sm:$0xff]  ;;  %s972_s17 = sshll.u32 %s1639_s9, 4  ;;  %s973_s17 = int_to_ptr.hbm [resolvable:$true] %s972_s17 }
   0xc   :  { %v63_v11 = vld [vmem:[%s1630_s0 + $0x60] sm:$0xff]  ;;  %v62_v12 = vld [vmem:[%s1630_s0 + $0x58] sm:$0xff]  ;;  %v76_v13 = vld [vmem:[%s1632_s2 + $0x48] sm:$0xff] }
   0xd   :  { %983 = vmatpush.xpose.msk.msra.mxu0 %vm163_vm0, %v64_v7  ;;  %v75_v14 = vld [vmem:[%s1632_s2 + $0x40] sm:$0xff]  ;;  %v74_v15 = vld [vmem:[%s1632_s2 + $0x38] sm:$0xff]  ;;  %v61_v16 = vld [vmem:[%s1630_s0 + $0x50] sm:$0xff] }
   0xe   :  { %1015 = vmatpush.xpose.msk.msra.mxu3 %vm163_vm0, %v64_v7  ;;  %155 = vperm.xlu0 %1063, %v81_v8   ;;  %v60_v17 = vld [vmem:[%s1630_s0 + $0x48] sm:$0xff]  ;;  %v73_v18 = vld [vmem:[%s1632_s2 + $0x30] sm:$0xff]  ;;  %v71_v20 = vld [vmem:[%s1632_s2 + $0x20] sm:$0xff] }
   0xf   :  { %145 = vperm.xlu1 %1064, %v79_v9   ;;  %135 = vperm.xlu2 %1065, %v77_v10   ;;  %v72_v19 = vld [vmem:[%s1632_s2 + $0x28] sm:$0xff]  ;;  %v59_v21 = vld [vmem:[%s1630_s0 + $0x40] sm:$0xff]  ;;  %v58_v22 = vld [vmem:[%s1630_s0 + $0x38] sm:$0xff] }
  0x10   :  { %v70_v23 = vld [vmem:[%s1632_s2 + $0x18] sm:$0xff]  ;;  %v69_v24 = vld [vmem:[%s1632_s2 + $0x10] sm:$0xff]  ;;  %v68_v25 = vld [vmem:[%s1632_s2 + $0x8] sm:$0xff] }
  0x11   :  { %984 = vmatpush.xpose.msk.msra.mxu0 %vm163_vm0, %v63_v11  ;;  %v57_v26 = vld [vmem:[%s1630_s0 + $0x30] sm:$0xff]  ;;  %v56_v27 = vld [vmem:[%s1630_s0 + $0x28] sm:$0xff]  ;;  %v67_v28 = vld [vmem:[%s1632_s2] sm:$0xff] }
  0x12   :  { %1016 = vmatpush.xpose.msk.msra.mxu3 %vm163_vm0, %v63_v11  ;;  %v404_v29 = vld [vmem:[%s1634_s4 + $0x78] sm:$0xff]  ;;  %v403_v30 = vld [vmem:[%s1634_s4 + $0x70] sm:$0xff]  ;;  %v55_v31 = vld [vmem:[%s1630_s0 + $0x20] sm:$0xff] }
  0x13   :  { %v54_v32 = vld [vmem:[%s1630_s0 + $0x18] sm:$0xff]  ;;  %v402_v33 = vld [vmem:[%s1634_s4 + $0x68] sm:$0xff]  ;;  %v401_v34 = vld [vmem:[%s1634_s4 + $0x60] sm:$0xff] }
  0x14   :  { %v400_v35 = vld [vmem:[%s1634_s4 + $0x58] sm:$0xff]  ;;  %v53_v36 = vld [vmem:[%s1630_s0 + $0x10] sm:$0xff]  ;;  %v52_v37 = vld [vmem:[%s1630_s0 + $0x8] sm:$0xff] }
  0x15   :  { %985 = vmatpush.xpose.msk.msra.mxu0 %vm163_vm0, %v62_v12  ;;  %v399_v38 = vld [vmem:[%s1634_s4 + $0x50] sm:$0xff]  ;;  %v398_v39 = vld [vmem:[%s1634_s4 + $0x48] sm:$0xff]  ;;  %v397_v40 = vld [vmem:[%s1634_s4 + $0x40] sm:$0xff] }
  0x16   :  { %1017 = vmatpush.xpose.msk.msra.mxu3 %vm163_vm0, %v62_v12  ;;  %130 = vperm.xlu0 %1063, %v76_v13   ;;  %v51_v41 = vld [vmem:[%s1630_s0] sm:$0xff]  ;;  %v45_v43 = vld [vmem:[%s1631_s1 + $0x50] sm:$0xff]  ;;  %v396_v44 = vld [vmem:[%s1634_s4 + $0x38] sm:$0xff] }
  0x17   :  { %125 = vperm.xlu1 %1064, %v75_v14   ;;  %120 = vperm.xlu2 %1065, %v74_v15   ;;  %v35_v42 = vld [vmem:[%s1631_s1] sm:$0xff]  ;;  %v395_v45 = vld [vmem:[%s1634_s4 + $0x30] sm:$0xff]  ;;  %v394_v46 = vld [vmem:[%s1634_s4 + $0x28] sm:$0xff] }
  0x18   :  { %v36_v47 = vld [vmem:[%s1631_s1 + $0x8] sm:$0xff]  ;;  %v46_v48 = vld [vmem:[%s1631_s1 + $0x58] sm:$0xff]  ;;  %v393_v49 = vld [vmem:[%s1634_s4 + $0x20] sm:$0xff] }
  0x19   :  { %986 = vmatpush.xpose.msk.msra.mxu0 %vm163_vm0, %v61_v16  ;;  %v392_v50 = vld [vmem:[%s1634_s4 + $0x18] sm:$0xff]  ;;  %v391_v51 = vld [vmem:[%s1634_s4 + $0x10] sm:$0xff]  ;;  %v47_v53 = vld [vmem:[%s1631_s1 + $0x60] sm:$0xff] }
  0x1a   :  { %1018 = vmatpush.xpose.msk.msra.mxu3 %vm163_vm0, %v61_v16  ;;  %v37_v52 = vld [vmem:[%s1631_s1 + $0x10] sm:$0xff]  ;;  %v390_v54 = vld [vmem:[%s1634_s4 + $0x8] sm:$0xff]  ;;  %v389_v55 = vld [vmem:[%s1634_s4] sm:$0xff] }
  0x1b   :  { %v614_v56 = vld [vmem:[%s1636_s6] sm:$0xff]  ;;  %v38_v57 = vld [vmem:[%s1631_s1 + $0x18] sm:$0xff]  ;;  %v48_v58 = vld [vmem:[%s1631_s1 + $0x68] sm:$0xff] }
  0x1c   :  { %v615_v59 = vld [vmem:[%s1636_s6 + $0x8] sm:$0xff]  ;;  %v616_v60 = vld [vmem:[%s1636_s6 + $0x10] sm:$0xff]  ;;  %v617_v61 = vld [vmem:[%s1636_s6 + $0x18] sm:$0xff] }
  0x1d   :  { %987 = vmatpush.xpose.msk.msra.mxu0 %vm163_vm0, %v60_v17  ;;  %v39_v62 = vld [vmem:[%s1631_s1 + $0x20] sm:$0xff]  ;;  %v49_v63 = vld [vmem:[%s1631_s1 + $0x70] sm:$0xff]  ;;  %v619_v1 = vld [vmem:[%s1636_s6 + $0x28] sm:$0xff] }
  0x1e   :  { %1019 = vmatpush.xpose.msk.msra.mxu3 %vm163_vm0, %v60_v17  ;;  %115 = vperm.xlu0 %1063, %v73_v18   ;;  %v618_v0 = vld [vmem:[%s1636_s6 + $0x20] sm:$0xff]  ;;  %v620_v2 = vld [vmem:[%s1636_s6 + $0x30] sm:$0xff]  ;;  %v40_v3 = vld [vmem:[%s1631_s1 + $0x28] sm:$0xff] }
  0x1f   :  { %110 = vperm.xlu1 %1064, %v72_v19   ;;  %105 = vperm.xlu2 %1065, %v71_v20   ;;  %v50_v4 = vld [vmem:[%s1631_s1 + $0x78] sm:$0xff]  ;;  %v622_v6 = vld [vmem:[%s1636_s6 + $0x40] sm:$0xff]  ;;  %v623_v7 = vld [vmem:[%s1636_s6 + $0x48] sm:$0xff] }
  0x20   :  { %v621_v5 = vld [vmem:[%s1636_s6 + $0x38] sm:$0xff]  ;;  %v41_v8 = vld [vmem:[%s1631_s1 + $0x30] sm:$0xff]  ;;  %v626_v11 = vld [vmem:[%s1636_s6 + $0x60] sm:$0xff] }
  0x21   :  { %988 = vmatpush.xpose.msk.msra.mxu0 %vm163_vm0, %v59_v21  ;;  %v624_v9 = vld [vmem:[%s1636_s6 + $0x50] sm:$0xff]  ;;  %v625_v10 = vld [vmem:[%s1636_s6 + $0x58] sm:$0xff]  ;;  %v627_v13 = vld [vmem:[%s1636_s6 + $0x68] sm:$0xff] }
  0x22   :  { %1020 = vmatpush.xpose.msk.msra.mxu3 %vm163_vm0, %v59_v21  ;;  %v42_v12 = vld [vmem:[%s1631_s1 + $0x38] sm:$0xff]  ;;  %v628_v14 = vld [vmem:[%s1636_s6 + $0x70] sm:$0xff]  ;;  %v43_v16 = vld [vmem:[%s1631_s1 + $0x40] sm:$0xff] }
  0x23   :  { %v629_v15 = vld [vmem:[%s1636_s6 + $0x78] sm:$0xff]  ;;  %v823_v17 = vld [vmem:[%s1637_s7] sm:$0xff]  ;;  %v824_v18 = vld [vmem:[%s1637_s7 + $0x8] sm:$0xff] }
  0x24   :  { %v825_v19 = vld [vmem:[%s1637_s7 + $0x10] sm:$0xff]  ;;  %v44_v20 = vld [vmem:[%s1631_s1 + $0x48] sm:$0xff]  ;;  %v826_v21 = vld [vmem:[%s1637_s7 + $0x18] sm:$0xff] }
  0x25   :  { %989 = vmatpush.xpose.msk.msra.mxu0 %vm163_vm0, %v58_v22 }
  0x26   :  { %1021 = vmatpush.xpose.msk.msra.mxu3 %vm163_vm0, %v58_v22  ;;  %100 = vperm.xlu0 %1063, %v70_v23   ;;  %v827_v22 = vld [vmem:[%s1637_s7 + $0x20] sm:$0xff]  ;;  %v828_v23 = vld [vmem:[%s1637_s7 + $0x28] sm:$0xff] }
  0x27   :  { %95 = vperm.xlu1 %1064, %v69_v24   ;;  %90 = vperm.xlu2 %1065, %v68_v25   ;;  %v829_v24 = vld [vmem:[%s1637_s7 + $0x30] sm:$0xff]  ;;  %v830_v25 = vld [vmem:[%s1637_s7 + $0x38] sm:$0xff] }
  0x29   :  { %990 = vmatpush.xpose.msk.msra.mxu0 %vm163_vm0, %v57_v26 }
  0x2a   :  { %1022 = vmatpush.xpose.msk.msra.mxu3 %vm163_vm0, %v57_v26  ;;  %v831_v26 = vld [vmem:[%s1637_s7 + $0x40] sm:$0xff] }
  0x2d   :  { %991 = vmatpush.xpose.msk.msra.mxu0 %vm163_vm0, %v56_v27 }
  0x2e   :  { %1023 = vmatpush.xpose.msk.msra.mxu3 %vm163_vm0, %v56_v27  ;;  %85 = vperm.xlu0 %1063, %v67_v28   ;;  %v832_v27 = vld [vmem:[%s1637_s7 + $0x48] sm:$0xff]  ;;  %v833_v28 = vld [vmem:[%s1637_s7 + $0x50] sm:$0xff] }
  0x2f   :  { %482 = vperm.xlu1 %1064, %v404_v29   ;;  %477 = vperm.xlu2 %1065, %v403_v30   ;;  %v834_v29 = vld [vmem:[%s1637_s7 + $0x58] sm:$0xff]  ;;  %v835_v30 = vld [vmem:[%s1637_s7 + $0x60] sm:$0xff] }
  0x31   :  { %992 = vmatpush.xpose.msk.msra.mxu0 %vm163_vm0, %v55_v31 }
  0x32   :  { %1024 = vmatpush.xpose.msk.msra.mxu3 %vm163_vm0, %v55_v31  ;;  %v836_v31 = vld [vmem:[%s1637_s7 + $0x68] sm:$0xff] }
  0x35   :  { %993 = vmatpush.xpose.msk.msra.mxu0 %vm163_vm0, %v54_v32 }
  0x36   :  { %1025 = vmatpush.xpose.msk.msra.mxu3 %vm163_vm0, %v54_v32  ;;  %472 = vperm.xlu0 %1063, %v402_v33   ;;  %v837_v32 = vld [vmem:[%s1637_s7 + $0x70] sm:$0xff]  ;;  %v838_v33 = vld [vmem:[%s1637_s7 + $0x78] sm:$0xff] }
  0x37   :  { %467 = vperm.xlu1 %1064, %v401_v34   ;;  %462 = vperm.xlu2 %1065, %v400_v35   ;;  %v956_v34 = vld [vmem:[#allocation2] sm:$0x1] }
  0x39   :  { %994 = vmatpush.xpose.msk.msra.mxu0 %vm163_vm0, %v53_v36 }
  0x3a   :  { %1026 = vmatpush.xpose.msk.msra.mxu3 %vm163_vm0, %v53_v36 }
  0x3d   :  { %995 = vmatpush.xpose.msk.msra.mxu0 %vm163_vm0, %v52_v37 }
  0x3e   :  { %1027 = vmatpush.xpose.msk.msra.mxu3 %vm163_vm0, %v52_v37  ;;  %457 = vperm.xlu0 %1063, %v399_v38  }
  0x3f   :  { %452 = vperm.xlu1 %1064, %v398_v39   ;;  %447 = vperm.xlu2 %1065, %v397_v40  }
  0x41   :  { %996 = vmatpush.xpose.msk.msra.mxu0 %vm163_vm0, %v51_v41 }
  0x42   :  { %1028 = vmatpush.xpose.msk.msra.mxu3 %vm163_vm0, %v51_v41 }
  0x44   :  { %997 = vmatmul.msk.f32.vlgmr.msra.gmra.mxu0 %vm163_vm0, %v35_v42 }
  0x45   :  { %1007 = vmatmul.msk.f32.vlgmr.msra.gmra.mxu3 %vm163_vm0, %v45_v43 }
  0x46   :  { %442 = vperm.xlu0 %1063, %v396_v44  }
  0x47   :  { %437 = vperm.xlu1 %1064, %v395_v45   ;;  %432 = vperm.xlu2 %1065, %v394_v46  }
  0x4c   :  { %998 = vmatmul.msk.f32.gmra.mxu0 %vm163_vm0, %v36_v47 }
  0x4d   :  { %1008 = vmatmul.msk.f32.gmra.mxu3 %vm163_vm0, %v46_v48 }
  0x4e   :  { %427 = vperm.xlu0 %1063, %v393_v49  }
  0x4f   :  { %422 = vperm.xlu1 %1064, %v392_v50   ;;  %417 = vperm.xlu2 %1065, %v391_v51  }
  0x54   :  { %999 = vmatmul.msk.f32.gmra.mxu0 %vm163_vm0, %v37_v52 }
  0x55   :  { %1009 = vmatmul.msk.f32.gmra.mxu3 %vm163_vm0, %v47_v53 }
  0x56   :  { %412 = vperm.xlu0 %1063, %v390_v54  }
  0x57   :  { %407 = vperm.xlu1 %1064, %v389_v55   ;;  %632 = vperm.xlu2 %1065, %v614_v56  }
  0x5c   :  { %1000 = vmatmul.msk.f32.gmra.mxu0 %vm163_vm0, %v38_v57 }
  0x5d   :  { %1010 = vmatmul.msk.f32.gmra.mxu3 %vm163_vm0, %v48_v58 }
  0x5e   :  { %637 = vperm.xlu0 %1063, %v615_v59  }
  0x5f   :  { %642 = vperm.xlu1 %1064, %v616_v60   ;;  %647 = vperm.xlu2 %1065, %v617_v61  }
  0x61   :  { %v141_v48 = vpop.permute.xlu2 %140 }
  0x64   :  { %1001 = vmatmul.msk.f32.gmra.mxu0 %vm163_vm0, %v39_v62 }
  0x65   :  { %1011 = vmatmul.msk.f32.gmra.mxu3 %vm163_vm0, %v49_v63 }
  0x66   :  { %652 = vperm.xlu0 %1063, %v618_v0  }
  0x67   :  { %657 = vperm.xlu1 %1064, %v619_v1   ;;  %662 = vperm.xlu2 %1065, %v620_v2  }
  0x69   :  { %v136_v63 = vpop.permute.xlu2 %135 }
  0x6c   :  { %1002 = vmatmul.msk.f32.gmra.mxu0 %vm163_vm0, %v40_v3 }
  0x6d   :  { %1012 = vmatmul.msk.f32.gmra.mxu3 %vm163_vm0, %v50_v4 }
  0x6e   :  { %667 = vperm.xlu0 %1063, %v621_v5  }
  0x6f   :  { %672 = vperm.xlu1 %1064, %v622_v6   ;;  %677 = vperm.xlu2 %1065, %v623_v7  }
  0x74   :  { %1003 = vmatmul.msk.f32.gmra.mxu0 %vm163_vm0, %v41_v8 }
  0x76   :  { %682 = vperm.xlu0 %1063, %v624_v9  }
  0x77   :  { %687 = vperm.xlu1 %1064, %v625_v10   ;;  %692 = vperm.xlu2 %1065, %v626_v11   ;;  %v121_v11 = vpop.permute.xlu2 %120 }
  0x78   :  { %v161_v43 = vpop.permute.xlu0 %160 }
  0x79   :  { %v151_v45 = vpop.permute.xlu1 %150 }
  0x7c   :  { %1004 = vmatmul.msk.f32.gmra.mxu0 %vm163_vm0, %v42_v12 }
  0x7e   :  { %697 = vperm.xlu0 %1063, %v627_v13  }
  0x7f   :  { %702 = vperm.xlu1 %1064, %v628_v14   ;;  %707 = vperm.xlu2 %1065, %v629_v15  }
  0x80   :  { %v156_v49 = vpop.permute.xlu0 %155 }
  0x81   :  { %v146_v55 = vpop.permute.xlu1 %145 }
  0x84   :  { %1005 = vmatmul.msk.f32.gmra.mxu0 %vm163_vm0, %v43_v16 }
  0x86   :  { %841 = vperm.xlu0 %1063, %v823_v17  }
  0x87   :  { %846 = vperm.xlu1 %1064, %v824_v18   ;;  %851 = vperm.xlu2 %1065, %v825_v19   ;;  %v106_v19 = vpop.permute.xlu2 %105 }
  0x88   :  { %v131_v4 = vpop.permute.xlu0 %130 }
  0x89   :  { %v126_v10 = vpop.permute.xlu1 %125 }
  0x8c   :  { %1006 = vmatmul.msk.f32.gmra.mxu0 %vm163_vm0, %v44_v20 }
  0x8e   :  { %856 = vperm.xlu0 %1063, %v826_v21  }
  0x8f   :  { %861 = vperm.xlu1 %1064, %v827_v22   ;;  %866 = vperm.xlu2 %1065, %v828_v23  }
  0x90   :  { %v116_v13 = vpop.permute.xlu0 %115 }
  0x91   :  { %v111_v15 = vpop.permute.xlu1 %110 }
  0x96   :  { %871 = vperm.xlu0 %1063, %v829_v24  }
  0x97   :  { %876 = vperm.xlu1 %1064, %v830_v25   ;;  %881 = vperm.xlu2 %1065, %v831_v26  }
  0x98   :  { %v101_v23 = vpop.permute.xlu0 %100 }
  0x9e   :  { %886 = vperm.xlu0 %1063, %v832_v27  }
  0x9f   :  { %891 = vperm.xlu1 %1064, %v833_v28   ;;  %896 = vperm.xlu2 %1065, %v834_v29  }
  0xa6   :  { %901 = vperm.xlu0 %1063, %v835_v30  }
  0xa7   :  { %906 = vperm.xlu1 %1064, %v836_v31   ;;  %911 = vperm.xlu2 %1065, %v837_v32  }
  0xae   :  { %916 = vperm.xlu0 %1063, %v838_v33   ;;  %v96_v33 = vpop.permute.xlu1 %95 }
  0xaf   :  { %959 = vperm.xlu1 %1064, %v956_v34  }
  0xc1   :  { %v1483_v35 = vpop.f32.mrf.mxu0 }
  0xc8   :  { %v307_v36 = vpop.f32.mrf.mxu3 }
  0xc9   :  { %v1485_v37 = vpop.f32.mrf.mxu0  ;;  %v308_v0 = vadd.f32 %v307_v36, %v136_v63  ;;  %v383_v63 = vld [vmem:[%s1633_s3 + $0x50] sm:$0xff] }
  0xcb   :  { %v351_v7 = vmul.f32 0.2, %v308_v0  ;;  %vm335_vm6 = vcmp.gt.f32.partialorder %v308_v0, 0.0 }
  0xcd   :  { %v367_v9 = vsel %vm335_vm6, %v308_v0, %v351_v7  ;;  %v384_v0 = vld [vmem:[%s1633_s3 + $0x58] sm:$0xff] }
  0xd0   :  { %v310_v38 = vpop.f32.mrf.mxu3 }
  0xd1   :  { %v1487_v39 = vpop.f32.mrf.mxu0  ;;  %v311_v59 = vadd.f32 %v310_v38, %v141_v48 }
  0xd2   :  { %v284_v34 = vadd.f32 %v1487_v39, %v96_v33 }
  0xd3   :  { %v352_v3 = vmul.f32 0.2, %v311_v59  ;;  %vm336_vm5 = vcmp.gt.f32.partialorder %v311_v59, 0.0 }
  0xd4   :  { %vm327_vm14 = vcmp.gt.f32.partialorder %v284_v34, 0.0 }
  0xd5   :  { %v368_v8 = vsel %vm336_vm5, %v311_v59, %v352_v3  ;;  %v379_v59 = vld [vmem:[%s1633_s3 + $0x30] sm:$0xff] }
  0xd8   :  { %v313_v40 = vpop.f32.mrf.mxu3 }
  0xd9   :  { %v1489_v41 = vpop.f32.mrf.mxu0  ;;  %v314_v57 = vadd.f32 %v313_v40, %v146_v55  ;;  %v91_v40 = vpop.permute.xlu2 %90  ;;  %v375_v55 = vld [vmem:[%s1633_s3 + $0x10] sm:$0xff] }
  0xda   :  { %v287_v30 = vadd.f32 %v1489_v41, %v101_v23 }
  0xdb   :  { %v353_v1 = vmul.f32 0.2, %v314_v57  ;;  %vm337_vm4 = vcmp.gt.f32.partialorder %v314_v57, 0.0 }
  0xdc   :  { %vm328_vm13 = vcmp.gt.f32.partialorder %v287_v30, 0.0 }
  0xdd   :  { %v369_v6 = vsel %vm337_vm4, %v314_v57, %v353_v1  ;;  %v377_v57 = vld [vmem:[%s1633_s3 + $0x20] sm:$0xff] }
  0xde   :  { %v385_v1 = vld [vmem:[%s1633_s3 + $0x60] sm:$0xff] }
  0xe0   :  { %v316_v42 = vpop.f32.mrf.mxu3 }
  0xe1   :  { %v1491_v44 = vpop.f32.mrf.mxu0  ;;  %v317_v52 = vadd.f32 %v316_v42, %v151_v45  ;;  %v281_v42 = vadd.f32 %v1485_v37, %v91_v40  ;;  %v86_v45 = vpop.permute.xlu0 %85 }
  0xe2   :  { %v290_v27 = vadd.f32 %v1491_v44, %v106_v19  ;;  %v344_v44 = vmul.f32 0.2, %v287_v30  ;;  %v278_v41 = vadd.f32 %v1483_v35, %v86_v45  ;;  %v373_v35 = vld [vmem:[%s1633_s3] sm:$0xff] }
  0xe3   :  { %v354_v62 = vmul.f32 0.2, %v317_v52  ;;  %vm338_vm3 = vcmp.gt.f32.partialorder %v317_v52, 0.0  ;;  %v342_v48 = vmul.f32 0.2, %v281_v42  ;;  %vm326_vm15 = vcmp.gt.f32.partialorder %v281_v42, 0.0 }
  0xe4   :  { %v345_v38 = vmul.f32 0.2, %v290_v27  ;;  %vm329_vm12 = vcmp.gt.f32.partialorder %v290_v27, 0.0  ;;  %v360_v39 = vsel %vm328_vm13, %v287_v30, %v344_v44  ;;  %v341_v37 = vmul.f32 0.2, %v278_v41 }
  0xe5   :  { %v370_v2 = vsel %vm338_vm3, %v317_v52, %v354_v62  ;;  %vm325_vm0 = vcmp.gt.f32.partialorder %v278_v41, 0.0  ;;  %v382_v62 = vld [vmem:[%s1633_s3 + $0x48] sm:$0xff] }
  0xe6   :  { %v357_v52 = vsel %vm325_vm0, %v278_v41, %v341_v37 }
  0xe8   :  { %v319_v46 = vpop.f32.mrf.mxu3 }
  0xe9   :  { %v292_v47 = vpop.f32.mrf.mxu0  ;;  %v320_v50 = vadd.f32 %v319_v46, %v156_v49  ;;  %v361_v46 = vsel %vm329_vm12, %v290_v27, %v345_v38 }
  0xea   :  { %v293_v24 = vadd.f32 %v292_v47, %v111_v15  ;;  %v343_v47 = vmul.f32 0.2, %v284_v34 }
  0xeb   :  { %v355_v54 = vmul.f32 0.2, %v320_v50  ;;  %vm339_vm1 = vcmp.gt.f32.partialorder %v320_v50, 0.0 }
  0xec   :  { %v346_v32 = vmul.f32 0.2, %v293_v24  ;;  %vm330_vm11 = vcmp.gt.f32.partialorder %v293_v24, 0.0  ;;  %v359_v49 = vsel %vm327_vm14, %v284_v34, %v343_v47 }
  0xed   :  { %v371_v61 = vsel %vm339_vm1, %v320_v50, %v355_v54  ;;  %v358_v50 = vsel %vm326_vm15, %v281_v42, %v342_v48  ;;  %v388_v54 = vld [vmem:[%s1633_s3 + $0x78] sm:$0xff] }
  0xf0   :  { %v322_v51 = vpop.f32.mrf.mxu3 }
  0xf1   :  { %v323_v53 = vadd.f32 %v322_v51, %v161_v43  ;;  %v295_v56 = vpop.f32.mrf.mxu0  ;;  %v362_v43 = vsel %vm330_vm11, %v293_v24, %v346_v32  ;;  %v387_v51 = vld [vmem:[%s1633_s3 + $0x70] sm:$0xff]  ;;  %v473_v24 = vpop.permute.xlu0 %472 }
  0xf2   :  { %v296_v20 = vadd.f32 %v295_v56, %v116_v13  ;;  %v376_v56 = vld [vmem:[%s1633_s3 + $0x18] sm:$0xff] }
  0xf3   :  { %vm340_vm2 = vcmp.gt.f32.partialorder %v323_v53, 0.0  ;;  %v356_v58 = vmul.f32 0.2, %v323_v53 }
  0xf4   :  { %v347_v29 = vmul.f32 0.2, %v296_v20  ;;  %vm331_vm10 = vcmp.gt.f32.partialorder %v296_v20, 0.0 }
  0xf5   :  { %v372_v60 = vsel %vm340_vm2, %v323_v53, %v356_v58  ;;  %v374_v53 = vld [vmem:[%s1633_s3 + $0x8] sm:$0xff] }
  0xf6   :  { %485 = vmatpush.msra.mxu1 %v372_v60  ;;  %1029 = vmatpush.msrb.mxu3 %v372_v60  ;;  %v363_v36 = vsel %vm331_vm10, %v296_v20, %v347_v29  ;;  %v378_v58 = vld [vmem:[%s1633_s3 + $0x28] sm:$0xff]  ;;  %v380_v60 = vld [vmem:[%s1633_s3 + $0x38] sm:$0xff] }
  0xf8   :  { %486 = vmatpush.msra.mxu1 %v371_v61  ;;  %1030 = vmatpush.msrb.mxu3 %v371_v61  ;;  %v381_v61 = vld [vmem:[%s1633_s3 + $0x40] sm:$0xff] }
  0xf9   :  { %v298_v5 = vpop.f32.mrf.mxu0 }
  0xfa   :  { %487 = vmatpush.msra.mxu1 %v370_v2  ;;  %1031 = vmatpush.msrb.mxu3 %v370_v2  ;;  %v299_v17 = vadd.f32 %v298_v5, %v121_v11  ;;  %v386_v2 = vld [vmem:[%s1633_s3 + $0x68] sm:$0xff] }
  0xfc   :  { %488 = vmatpush.msra.mxu1 %v369_v6  ;;  %1032 = vmatpush.msrb.mxu3 %v369_v6  ;;  %v348_v26 = vmul.f32 0.2, %v299_v17  ;;  %vm332_vm9 = vcmp.gt.f32.partialorder %v299_v17, 0.0  ;;  %v478_v6 = vpop.permute.xlu2 %477 }
  0xfe   :  { %489 = vmatpush.msra.mxu1 %v368_v8  ;;  %1033 = vmatpush.msrb.mxu3 %v368_v8  ;;  %v364_v31 = vsel %vm332_vm9, %v299_v17, %v348_v26  ;;  %v483_v8 = vpop.permute.xlu1 %482 }
 0x100   :  { %490 = vmatpush.msra.mxu1 %v367_v9  ;;  %1034 = vmatpush.msrb.mxu3 %v367_v9 }
 0x101   :  { %v301_v12 = vpop.f32.mrf.mxu0 }
 0x102   :  { %v302_v14 = vadd.f32 %v301_v12, %v126_v10 }
 0x104   :  { %v349_v22 = vmul.f32 0.2, %v302_v14  ;;  %vm333_vm8 = vcmp.gt.f32.partialorder %v302_v14, 0.0  ;;  %v463_v27 = vpop.permute.xlu2 %462 }
 0x106   :  { %v365_v28 = vsel %vm333_vm8, %v302_v14, %v349_v22 }
 0x109   :  { %v304_v16 = vpop.f32.mrf.mxu0 }
 0x10a   :  { %v305_v18 = vadd.f32 %v304_v16, %v131_v4 }
 0x10c   :  { %vm334_vm7 = vcmp.gt.f32.partialorder %v305_v18, 0.0  ;;  %v350_v21 = vmul.f32 0.2, %v305_v18 }
 0x10e   :  { %v366_v25 = vsel %vm334_vm7, %v305_v18, %v350_v21 }
 0x10f   :  { %491 = vmatpush.msra.mxu1 %v366_v25  ;;  %1035 = vmatpush.msrb.mxu3 %v366_v25  ;;  %v468_v25 = vpop.permute.xlu1 %467 }
 0x111   :  { %492 = vmatpush.msra.mxu1 %v365_v28  ;;  %1036 = vmatpush.msrb.mxu3 %v365_v28  ;;  %v458_v28 = vpop.permute.xlu0 %457 }
 0x113   :  { %493 = vmatpush.msra.mxu1 %v364_v31  ;;  %1037 = vmatpush.msrb.mxu3 %v364_v31  ;;  %v448_v31 = vpop.permute.xlu2 %447 }
 0x115   :  { %494 = vmatpush.msra.mxu1 %v363_v36  ;;  %1038 = vmatpush.msrb.mxu3 %v363_v36 }
 0x117   :  { %495 = vmatpush.msra.mxu1 %v362_v43  ;;  %1039 = vmatpush.msrb.mxu3 %v362_v43  ;;  %v453_v29 = vpop.permute.xlu1 %452 }
 0x119   :  { %496 = vmatpush.msra.mxu1 %v361_v46  ;;  %1040 = vmatpush.msrb.mxu3 %v361_v46  ;;  %v443_v33 = vpop.permute.xlu0 %442 }
 0x11b   :  { %497 = vmatpush.msra.mxu1 %v360_v39  ;;  %1041 = vmatpush.msrb.mxu3 %v360_v39 }
 0x11d   :  { %498 = vmatpush.msra.mxu1 %v359_v49  ;;  %1042 = vmatpush.msrb.mxu3 %v359_v49  ;;  %v433_v49 = vpop.permute.xlu2 %432 }
 0x11f   :  { %499 = vmatpush.msra.mxu1 %v358_v50  ;;  %1043 = vmatpush.msrb.mxu3 %v358_v50  ;;  %v438_v40 = vpop.permute.xlu1 %437 }
 0x121   :  { %500 = vmatpush.msra.mxu1 %v357_v52  ;;  %1044 = vmatpush.msrb.mxu3 %v357_v52 }
 0x122   :  { %501 = vmatmul.f32.vlgmr.msra.gmra.mxu1 %v373_v35  ;;  %543 = vmatmul.f32.vlgmr.msrb.gmra.mxu3 %v387_v51  ;;  %v428_v51 = vpop.permute.xlu0 %427 }
 0x12a   :  { %504 = vmatmul.f32.gmra.mxu1 %v374_v53  ;;  %546 = vmatmul.f32.gmra.mxu3 %v388_v54 }
 0x132   :  { %507 = vmatmul.f32.gmra.mxu1 %v375_v55  ;;  %v423_v55 = vpop.permute.xlu1 %422 }
 0x13a   :  { %510 = vmatmul.f32.gmra.mxu1 %v376_v56 }
 0x142   :  { %513 = vmatmul.f32.gmra.mxu1 %v377_v57 }
 0x14a   :  { %516 = vmatmul.f32.gmra.mxu1 %v378_v58 }
 0x152   :  { %519 = vmatmul.f32.gmra.mxu1 %v379_v59 }
 0x15a   :  { %522 = vmatmul.f32.gmra.mxu1 %v380_v60 }
 0x162   :  { %525 = vmatmul.f32.gmra.mxu1 %v381_v61 }
 0x16a   :  { %528 = vmatmul.f32.gmra.mxu1 %v382_v62 }
 0x172   :  { %531 = vmatmul.f32.gmra.mxu1 %v383_v63 }
 0x17a   :  { %534 = vmatmul.f32.gmra.mxu1 %v384_v0 }
 0x182   :  { %537 = vmatmul.f32.gmra.mxu1 %v385_v1  ;;  %v418_v1 = vpop.permute.xlu2 %417 }
 0x18a   :  { %540 = vmatmul.f32.gmra.mxu1 %v386_v2 }
 0x19f   :  { %v1546_v3 = vpop.f32.mrf.mxu1 }
 0x1a5   :  { %v544_v4 = vpop.f32.mrf.mxu3 }
 0x1a6   :  { %v545_v7 = vadd.f32 %v544_v4, %v478_v6 }
 0x1a7   :  { %v1548_v5 = vpop.f32.mrf.mxu1 }
 0x1a8   :  { %v580_v13 = vmul.f32 0.2, %v545_v7  ;;  %vm564_vm2 = vcmp.gt.f32.partialorder %v545_v7, 0.0 }
 0x1aa   :  { %v596_v15 = vsel %vm564_vm2, %v545_v7, %v580_v13  ;;  %v413_v7 = vpop.permute.xlu0 %412 }
 0x1ad   :  { %v547_v9 = vpop.f32.mrf.mxu3 }
 0x1ae   :  { %v548_v10 = vadd.f32 %v547_v9, %v483_v8  ;;  %v506_v8 = vadd.f32 %v1548_v5, %v413_v7 }
 0x1af   :  { %v1550_v11 = vpop.f32.mrf.mxu1 }
 0x1b0   :  { %vm565_vm1 = vcmp.gt.f32.partialorder %v548_v10, 0.0  ;;  %v581_v12 = vmul.f32 0.2, %v548_v10  ;;  %v509_v2 = vadd.f32 %v1550_v11, %v418_v1  ;;  %vm551_vm15 = vcmp.gt.f32.partialorder %v506_v8, 0.0 }
 0x1b2   :  { %v597_v14 = vsel %vm565_vm1, %v548_v10, %v581_v12  ;;  %v408_v12 = vpop.permute.xlu1 %407  ;;  %vm552_vm14 = vcmp.gt.f32.partialorder %v509_v2, 0.0 }
 0x1b3   :  { %710 = vmatpush.msra.mxu2 %v597_v14  ;;  %1045 = vmatpush.msra.mxu3 %v597_v14  ;;  %v503_v13 = vadd.f32 %v1546_v3, %v408_v12  ;;  %v598_v3 = vld [vmem:[%s1635_s5] sm:$0xff] }
 0x1b5   :  { %711 = vmatpush.msra.mxu2 %v596_v15  ;;  %1046 = vmatpush.msra.mxu3 %v596_v15  ;;  %v568_v15 = vmul.f32 0.2, %v509_v2  ;;  %v566_v5 = vmul.f32 0.2, %v503_v13  ;;  %vm550_vm0 = vcmp.gt.f32.partialorder %v503_v13, 0.0 }
 0x1b7   :  { %v1552_v16 = vpop.f32.mrf.mxu1 }
 0x1b8   :  { %v512_v62 = vadd.f32 %v1552_v16, %v423_v55  ;;  %v567_v16 = vmul.f32 0.2, %v506_v8 }
 0x1ba   :  { %v569_v10 = vmul.f32 0.2, %v512_v62  ;;  %vm553_vm13 = vcmp.gt.f32.partialorder %v512_v62, 0.0 }
 0x1bc   :  { %v585_v11 = vsel %vm553_vm13, %v512_v62, %v569_v10 }
 0x1bf   :  { %v514_v17 = vpop.f32.mrf.mxu1 }
 0x1c0   :  { %v515_v59 = vadd.f32 %v514_v17, %v428_v51  ;;  %v584_v17 = vsel %vm552_vm14, %v509_v2, %v568_v15 }
 0x1c2   :  { %v570_v6 = vmul.f32 0.2, %v515_v59  ;;  %vm554_vm12 = vcmp.gt.f32.partialorder %v515_v59, 0.0 }
 0x1c4   :  { %v586_v14 = vsel %vm554_vm12, %v515_v59, %v570_v6 }
 0x1c7   :  { %v517_v18 = vpop.f32.mrf.mxu1 }
 0x1c8   :  { %v518_v56 = vadd.f32 %v517_v18, %v433_v49  ;;  %v583_v18 = vsel %vm551_vm15, %v506_v8, %v567_v16 }
 0x1ca   :  { %v571_v0 = vmul.f32 0.2, %v518_v56  ;;  %vm555_vm11 = vcmp.gt.f32.partialorder %v518_v56, 0.0 }
 0x1cc   :  { %v587_v9 = vsel %vm555_vm11, %v518_v56, %v571_v0 }
 0x1cf   :  { %v520_v19 = vpop.f32.mrf.mxu1 }
 0x1d0   :  { %v521_v52 = vadd.f32 %v520_v19, %v438_v40  ;;  %v613_v19 = vld [vmem:[%s1635_s5 + $0x78] sm:$0xff] }
 0x1d2   :  { %v572_v61 = vmul.f32 0.2, %v521_v52  ;;  %vm556_vm10 = vcmp.gt.f32.partialorder %v521_v52, 0.0 }
 0x1d4   :  { %v588_v4 = vsel %vm556_vm10, %v521_v52, %v572_v61 }
 0x1d7   :  { %v523_v20 = vpop.f32.mrf.mxu1 }
 0x1d8   :  { %v524_v37 = vadd.f32 %v523_v20, %v443_v33  ;;  %v582_v20 = vsel %vm550_vm0, %v503_v13, %v566_v5  ;;  %v610_v33 = vld [vmem:[%s1635_s5 + $0x60] sm:$0xff] }
 0x1da   :  { %v573_v58 = vmul.f32 0.2, %v524_v37  ;;  %vm557_vm9 = vcmp.gt.f32.partialorder %v524_v37, 0.0 }
 0x1dc   :  { %v589_v63 = vsel %vm557_vm9, %v524_v37, %v573_v58 }
 0x1df   :  { %v526_v21 = vpop.f32.mrf.mxu1 }
 0x1e0   :  { %v527_v47 = vadd.f32 %v526_v21, %v448_v31  ;;  %v599_v21 = vld [vmem:[%s1635_s5 + $0x8] sm:$0xff]  ;;  %v609_v31 = vld [vmem:[%s1635_s5 + $0x58] sm:$0xff] }
 0x1e2   :  { %v574_v54 = vmul.f32 0.2, %v527_v47  ;;  %vm558_vm8 = vcmp.gt.f32.partialorder %v527_v47, 0.0 }
 0x1e4   :  { %v590_v60 = vsel %vm558_vm8, %v527_v47, %v574_v54 }
 0x1e7   :  { %v529_v22 = vpop.f32.mrf.mxu1 }
 0x1e8   :  { %v530_v45 = vadd.f32 %v529_v22, %v453_v29  ;;  %v600_v22 = vld [vmem:[%s1635_s5 + $0x10] sm:$0xff]  ;;  %v607_v29 = vld [vmem:[%s1635_s5 + $0x48] sm:$0xff] }
 0x1ea   :  { %v575_v35 = vmul.f32 0.2, %v530_v45  ;;  %vm559_vm7 = vcmp.gt.f32.partialorder %v530_v45, 0.0 }
 0x1ec   :  { %v591_v57 = vsel %vm559_vm7, %v530_v45, %v575_v35 }
 0x1ef   :  { %v532_v23 = vpop.f32.mrf.mxu1 }
 0x1f0   :  { %v533_v42 = vadd.f32 %v532_v23, %v458_v28  ;;  %v601_v23 = vld [vmem:[%s1635_s5 + $0x18] sm:$0xff]  ;;  %v606_v28 = vld [vmem:[%s1635_s5 + $0x40] sm:$0xff] }
 0x1f2   :  { %v576_v48 = vmul.f32 0.2, %v533_v42  ;;  %vm560_vm6 = vcmp.gt.f32.partialorder %v533_v42, 0.0 }
 0x1f4   :  { %v592_v53 = vsel %vm560_vm6, %v533_v42, %v576_v48 }
 0x1f7   :  { %v535_v26 = vpop.f32.mrf.mxu1 }
 0x1f8   :  { %v536_v36 = vadd.f32 %v535_v26, %v463_v27  ;;  %v604_v26 = vld [vmem:[%s1635_s5 + $0x30] sm:$0xff]  ;;  %v605_v27 = vld [vmem:[%s1635_s5 + $0x38] sm:$0xff] }
 0x1fa   :  { %v577_v46 = vmul.f32 0.2, %v536_v36  ;;  %vm561_vm5 = vcmp.gt.f32.partialorder %v536_v36, 0.0 }
 0x1fc   :  { %v593_v50 = vsel %vm561_vm5, %v536_v36, %v577_v46  ;;  %v638_v36 = vpop.permute.xlu0 %637 }
 0x1ff   :  { %v538_v30 = vpop.f32.mrf.mxu1 }
 0x200   :  { %v539_v32 = vadd.f32 %v538_v30, %v468_v25  ;;  %v603_v25 = vld [vmem:[%s1635_s5 + $0x28] sm:$0xff]  ;;  %v608_v30 = vld [vmem:[%s1635_s5 + $0x50] sm:$0xff] }
 0x202   :  { %v578_v44 = vmul.f32 0.2, %v539_v32  ;;  %vm562_vm4 = vcmp.gt.f32.partialorder %v539_v32, 0.0 }
 0x204   :  { %v594_v39 = vsel %vm562_vm4, %v539_v32, %v578_v44  ;;  %v633_v32 = vpop.permute.xlu2 %632  ;;  %v612_v44 = vld [vmem:[%s1635_s5 + $0x70] sm:$0xff] }
 0x207   :  { %v541_v34 = vpop.f32.mrf.mxu1 }
 0x208   :  { %v542_v38 = vadd.f32 %v541_v34, %v473_v24  ;;  %v602_v24 = vld [vmem:[%s1635_s5 + $0x20] sm:$0xff]  ;;  %v643_v34 = vpop.permute.xlu1 %642 }
 0x20a   :  { %vm563_vm3 = vcmp.gt.f32.partialorder %v542_v38, 0.0  ;;  %v579_v43 = vmul.f32 0.2, %v542_v38 }
 0x20c   :  { %v595_v41 = vsel %vm563_vm3, %v542_v38, %v579_v43  ;;  %v611_v38 = vld [vmem:[%s1635_s5 + $0x68] sm:$0xff]  ;;  %v648_v40 = vpop.permute.xlu2 %647  ;;  %v653_v43 = vpop.permute.xlu0 %652  ;;  %s1093_s5 = smov [#allocation3]  }
 0x20d   :  { %712 = vmatpush.msra.mxu2 %v595_v41  ;;  %1047 = vmatpush.msra.mxu3 %v595_v41  ;;  %s970_s14 = sshll.u32 %s1093_s5, 4  ;;  %s971_s14 = int_to_ptr.vmem [resolvable:$true] %s970_s14 }
 0x20f   :  { %713 = vmatpush.msra.mxu2 %v594_v39  ;;  %1048 = vmatpush.msra.mxu3 %v594_v39 }
 0x210   :  { %v658_v42 = vpop.permute.xlu1 %657 }
 0x211   :  { %714 = vmatpush.msra.mxu2 %v593_v50  ;;  %1049 = vmatpush.msra.mxu3 %v593_v50 }
 0x213   :  { %715 = vmatpush.msra.mxu2 %v592_v53  ;;  %1050 = vmatpush.msra.mxu3 %v592_v53 }
 0x214   :  { %v663_v45 = vpop.permute.xlu2 %662  ;;  %v668_v46 = vpop.permute.xlu0 %667 }
 0x215   :  { %716 = vmatpush.msra.mxu2 %v591_v57  ;;  %1051 = vmatpush.msra.mxu3 %v591_v57 }
 0x217   :  { %717 = vmatpush.msra.mxu2 %v590_v60  ;;  %1052 = vmatpush.msra.mxu3 %v590_v60 }
 0x218   :  { %v673_v41 = vpop.permute.xlu1 %672 }
 0x219   :  { %718 = vmatpush.msra.mxu2 %v589_v63  ;;  %1053 = vmatpush.msra.mxu3 %v589_v63 }
 0x21b   :  { %719 = vmatpush.msra.mxu2 %v588_v4  ;;  %1054 = vmatpush.msra.mxu3 %v588_v4 }
 0x21c   :  { %v1606_v47 = vpop.permute.xlu2 %677  ;;  %v1610_v48 = vpop.permute.xlu0 %682 }
 0x21d   :  { %720 = vmatpush.msra.mxu2 %v587_v9  ;;  %1055 = vmatpush.msra.mxu3 %v587_v9 }
 0x21f   :  { %721 = vmatpush.msra.mxu2 %v586_v14  ;;  %1056 = vmatpush.msra.mxu3 %v586_v14 }
 0x220   :  { %v1608_v39 = vpop.permute.xlu1 %687 }
 0x221   :  { %722 = vmatpush.msra.mxu2 %v585_v11  ;;  %1057 = vmatpush.msra.mxu3 %v585_v11 }
 0x223   :  { %723 = vmatpush.msra.mxu2 %v584_v17  ;;  %1058 = vmatpush.msra.mxu3 %v584_v17 }
 0x224   :  { %v1612_v37 = vpop.permute.xlu2 %692  ;;  %v1616_v35 = vpop.permute.xlu0 %697 }
 0x225   :  { %724 = vmatpush.msra.mxu2 %v583_v18  ;;  %1059 = vmatpush.msra.mxu3 %v583_v18 }
 0x227   :  { %725 = vmatpush.msra.mxu2 %v582_v20  ;;  %1060 = vmatpush.msra.mxu3 %v582_v20 }
 0x228   :  { %726 = vmatmul.f32.vlgmr.msra.gmra.mxu2 %v598_v3  ;;  %771 = vmatmul.f32.vlgmr.msra.gmra.mxu3 %v613_v19  ;;  %v1614_v50 = vpop.permute.xlu1 %702 }
 0x22c   :  { %v1618_v55 = vpop.permute.xlu2 %707  ;;  %v842_v59 = vpop.permute.xlu0 %841 }
 0x230   :  { %729 = vmatmul.f32.gmra.mxu2 %v599_v21  ;;  %v847_v58 = vpop.permute.xlu1 %846 }
 0x234   :  { %v852_v4 = vpop.permute.xlu2 %851  ;;  %v857_v13 = vpop.permute.xlu0 %856 }
 0x238   :  { %732 = vmatmul.f32.gmra.mxu2 %v600_v22  ;;  %v862_v21 = vpop.permute.xlu1 %861 }
 0x240   :  { %735 = vmatmul.f32.gmra.mxu2 %v601_v23  ;;  %v867_v23 = vpop.permute.xlu2 %866 }
 0x248   :  { %738 = vmatmul.f32.gmra.mxu2 %v602_v24 }
 0x250   :  { %741 = vmatmul.f32.gmra.mxu2 %v603_v25 }
 0x258   :  { %744 = vmatmul.f32.gmra.mxu2 %v604_v26  ;;  %v872_v26 = vpop.permute.xlu0 %871 }
 0x260   :  { %747 = vmatmul.f32.gmra.mxu2 %v605_v27 }
 0x268   :  { %750 = vmatmul.f32.gmra.mxu2 %v606_v28 }
 0x270   :  { %753 = vmatmul.f32.gmra.mxu2 %v607_v29 }
 0x278   :  { %756 = vmatmul.f32.gmra.mxu2 %v608_v30 }
 0x280   :  { %759 = vmatmul.f32.gmra.mxu2 %v609_v31  ;;  %v877_v31 = vpop.permute.xlu1 %876 }
 0x288   :  { %762 = vmatmul.f32.gmra.mxu2 %v610_v33 }
 0x290   :  { %765 = vmatmul.f32.gmra.mxu2 %v611_v38 }
 0x298   :  { %768 = vmatmul.f32.gmra.mxu2 %v612_v44  ;;  %v882_v44 = vpop.permute.xlu2 %881 }
 0x2ab   :  { %v727_v49 = vpop.f32.mrf.mxu2 }
 0x2ac   :  { %v728_v51 = vadd.f32 %v727_v49, %v633_v32 }
 0x2ae   :  { %v791_v52 = vmul.f32 0.2, %v728_v51  ;;  %vm775_vm1 = vcmp.gt.f32.partialorder %v728_v51, 0.0 }
 0x2b0   :  { %v807_v56 = vsel %vm775_vm1, %v728_v51, %v791_v52 }
 0x2b1   :  { %v919_v61 = vmul.f32 %v842_v59, %v807_v56 }
 0x2b3   :  { %v730_v53 = vpop.f32.mrf.mxu2 }
 0x2b4   :  { %v731_v54 = vadd.f32 %v730_v53, %v638_v36 }
 0x2b6   :  { %vm776_vm2 = vcmp.gt.f32.partialorder %v731_v54, 0.0  ;;  %v792_v57 = vmul.f32 0.2, %v731_v54 }
 0x2b8   :  { %v808_v60 = vsel %vm776_vm2, %v731_v54, %v792_v57 }
 0x2b9   :  { %v920_v62 = vmul.f32 %v847_v58, %v808_v60 }
 0x2bb   :  { %v935_v63 = vadd.f32 %v920_v62, %v919_v61  ;;  %v733_v0 = vpop.f32.mrf.mxu2  ;;  %v892_v62 = vpop.permute.xlu1 %891 }
 0x2bc   :  { %v734_v1 = vadd.f32 %v733_v0, %v643_v34 }
 0x2be   :  { %vm777_vm3 = vcmp.gt.f32.partialorder %v734_v1, 0.0  ;;  %v793_v2 = vmul.f32 0.2, %v734_v1 }
 0x2c0   :  { %v809_v6 = vsel %vm777_vm3, %v734_v1, %v793_v2 }
 0x2c1   :  { %v921_v7 = vmul.f32 %v852_v4, %v809_v6 }
 0x2c3   :  { %v936_v8 = vadd.f32 %v935_v63, %v921_v7  ;;  %v736_v9 = vpop.f32.mrf.mxu2  ;;  %v772_v7 = vpop.f32.mrf.mxu3 }
 0x2c4   :  { %v737_v10 = vadd.f32 %v736_v9, %v648_v40 }
 0x2c6   :  { %vm778_vm4 = vcmp.gt.f32.partialorder %v737_v10, 0.0  ;;  %v794_v12 = vmul.f32 0.2, %v737_v10 }
 0x2c8   :  { %v810_v14 = vsel %vm778_vm4, %v737_v10, %v794_v12  ;;  %v897_v10 = vpop.permute.xlu2 %896 }
 0x2c9   :  { %v922_v15 = vmul.f32 %v857_v13, %v810_v14 }
 0x2cb   :  { %v937_v11 = vadd.f32 %v936_v8, %v922_v15  ;;  %v739_v16 = vpop.f32.mrf.mxu2 }
 0x2cc   :  { %v740_v22 = vadd.f32 %v739_v16, %v653_v43 }
 0x2ce   :  { %v795_v27 = vmul.f32 0.2, %v740_v22  ;;  %vm779_vm5 = vcmp.gt.f32.partialorder %v740_v22, 0.0 }
 0x2d0   :  { %v811_v32 = vsel %vm779_vm5, %v740_v22, %v795_v27  ;;  %v912_v27 = vpop.permute.xlu2 %911 }
 0x2d1   :  { %v923_v43 = vmul.f32 %v862_v21, %v811_v32 }
 0x2d3   :  { %v742_v17 = vpop.f32.mrf.mxu2  ;;  %v938_v56 = vadd.f32 %v937_v11, %v923_v43  ;;  %v773_v11 = vadd.f32 %v772_v7, %v1618_v55 }
 0x2d4   :  { %v743_v24 = vadd.f32 %v742_v17, %v658_v42 }
 0x2d5   :  { %v806_v21 = vmul.f32 0.2, %v773_v11  ;;  %vm790_vm15 = vcmp.gt.f32.partialorder %v773_v11, 0.0 }
 0x2d6   :  { %v796_v29 = vmul.f32 0.2, %v743_v24  ;;  %vm780_vm6 = vcmp.gt.f32.partialorder %v743_v24, 0.0 }
 0x2d8   :  { %v812_v36 = vsel %vm780_vm6, %v743_v24, %v796_v29 }
 0x2d9   :  { %v924_v52 = vmul.f32 %v867_v23, %v812_v36 }
 0x2db   :  { %v745_v5 = vpop.f32.mrf.mxu2  ;;  %v939_v60 = vadd.f32 %v938_v56, %v924_v52 }
 0x2dc   :  { %v746_v28 = vadd.f32 %v745_v5, %v663_v45 }
 0x2de   :  { %v797_v33 = vmul.f32 0.2, %v746_v28  ;;  %vm781_vm7 = vcmp.gt.f32.partialorder %v746_v28, 0.0 }
 0x2e0   :  { %v813_v49 = vsel %vm781_vm7, %v746_v28, %v797_v33  ;;  %v822_v28 = vsel %vm790_vm15, %v773_v11, %v806_v21 }
 0x2e1   :  { %v925_v57 = vmul.f32 %v872_v26, %v813_v49 }
 0x2e3   :  { %v748_v18 = vpop.f32.mrf.mxu2  ;;  %v940_v0 = vadd.f32 %v939_v60, %v925_v57 }
 0x2e4   :  { %v749_v30 = vadd.f32 %v748_v18, %v668_v46  ;;  %v887_v46 = vpop.permute.xlu0 %886 }
 0x2e6   :  { %v798_v38 = vmul.f32 0.2, %v749_v30  ;;  %vm782_vm8 = vcmp.gt.f32.partialorder %v749_v30, 0.0 }
 0x2e8   :  { %v814_v53 = vsel %vm782_vm8, %v749_v30, %v798_v38 }
 0x2e9   :  { %v926_v61 = vmul.f32 %v877_v31, %v814_v53 }
 0x2eb   :  { %v751_v3 = vpop.f32.mrf.mxu2  ;;  %v941_v8 = vadd.f32 %v940_v0, %v926_v61 }
 0x2ec   :  { %v752_v34 = vadd.f32 %v751_v3, %v673_v41  ;;  %v902_v15 = vpop.permute.xlu0 %901 }
 0x2ee   :  { %v799_v51 = vmul.f32 0.2, %v752_v34  ;;  %vm783_vm9 = vcmp.gt.f32.partialorder %v752_v34, 0.0 }
 0x2f0   :  { %v815_v58 = vsel %vm783_vm9, %v752_v34, %v799_v51 }
 0x2f1   :  { %v927_v1 = vmul.f32 %v882_v44, %v815_v58 }
 0x2f3   :  { %v754_v19 = vpop.f32.mrf.mxu2  ;;  %v942_v13 = vadd.f32 %v941_v8, %v927_v1 }
 0x2f4   :  { %v755_v40 = vadd.f32 %v754_v19, %v1606_v47  ;;  %v917_v31 = vpop.permute.xlu0 %916 }
 0x2f5   :  { %v934_v32 = vmul.f32 %v917_v31, %v822_v28 }
 0x2f6   :  { %v800_v54 = vmul.f32 0.2, %v755_v40  ;;  %vm784_vm10 = vcmp.gt.f32.partialorder %v755_v40, 0.0 }
 0x2f8   :  { %v816_v63 = vsel %vm784_vm10, %v755_v40, %v800_v54 }
 0x2f9   :  { %v928_v9 = vmul.f32 %v887_v46, %v816_v63 }
 0x2fb   :  { %v757_v20 = vpop.f32.mrf.mxu2  ;;  %v943_v17 = vadd.f32 %v942_v13, %v928_v9 }
 0x2fc   :  { %v758_v45 = vadd.f32 %v757_v20, %v1610_v48  ;;  %v907_v20 = vpop.permute.xlu1 %906 }
 0x2fe   :  { %v801_v47 = vmul.f32 0.2, %v758_v45  ;;  %vm785_vm11 = vcmp.gt.f32.partialorder %v758_v45, 0.0 }
 0x300   :  { %v817_v4 = vsel %vm785_vm11, %v758_v45, %v801_v47 }
 0x301   :  { %v929_v14 = vmul.f32 %v892_v62, %v817_v4 }
 0x303   :  { %v760_v25 = vpop.f32.mrf.mxu2  ;;  %v944_v3 = vadd.f32 %v943_v17, %v929_v14 }
 0x304   :  { %v761_v41 = vadd.f32 %v760_v25, %v1608_v39 }
 0x306   :  { %v802_v48 = vmul.f32 0.2, %v761_v41  ;;  %vm786_vm12 = vcmp.gt.f32.partialorder %v761_v41, 0.0 }
 0x30b   :  { %v763_v42 = vpop.f32.mrf.mxu2 }
 0x30c   :  { %v764_v59 = vadd.f32 %v763_v42, %v1612_v37  ;;  %v818_v37 = vsel %vm786_vm12, %v761_v41, %v802_v48 }
 0x30d   :  { %v930_v5 = vmul.f32 %v897_v10, %v818_v37 }
 0x30e   :  { %v803_v6 = vmul.f32 0.2, %v764_v59  ;;  %vm787_vm13 = vcmp.gt.f32.partialorder %v764_v59, 0.0 }
 0x30f   :  { %v945_v23 = vadd.f32 %v944_v3, %v930_v5 }
 0x310   :  { %v819_v16 = vsel %vm787_vm13, %v764_v59, %v803_v6 }
 0x311   :  { %v931_v19 = vmul.f32 %v902_v15, %v819_v16 }
 0x313   :  { %v766_v2 = vpop.f32.mrf.mxu2  ;;  %v946_v26 = vadd.f32 %v945_v23, %v931_v19 }
 0x314   :  { %v767_v39 = vadd.f32 %v766_v2, %v1616_v35 }
 0x316   :  { %v804_v12 = vmul.f32 0.2, %v767_v39  ;;  %vm788_vm14 = vcmp.gt.f32.partialorder %v767_v39, 0.0 }
 0x318   :  { %v820_v18 = vsel %vm788_vm14, %v767_v39, %v804_v12 }
 0x319   :  { %v932_v24 = vmul.f32 %v907_v20, %v820_v18 }
 0x31b   :  { %v769_v35 = vpop.f32.mrf.mxu2  ;;  %v947_v29 = vadd.f32 %v946_v26, %v932_v24 }
 0x31c   :  { %v770_v22 = vadd.f32 %v769_v35, %v1614_v50  ;;  %v960_v50 = vpop.permute.xlu1 %959 }
 0x31d   :  { %v962_v44 = vperm.slane %v960_v50, 0 }
 0x31e   :  { %vm789_vm0 = vcmp.gt.f32.partialorder %v770_v22, 0.0  ;;  %v805_v25 = vmul.f32 0.2, %v770_v22 }
 0x320   :  { %v821_v55 = vsel %vm789_vm0, %v770_v22, %v805_v25 }
 0x321   :  { %v933_v30 = vmul.f32 %v912_v27, %v821_v55 }
 0x323   :  { %v948_v33 = vadd.f32 %v947_v29, %v933_v30 }
 0x325   :  { %v949_v34 = vadd.f32 %v948_v33, %v934_v32 }
 0x327   :  { %v950_v36 = vrot.slane %v949_v34, 4 }
 0x329   :  { %v951_v38 = vadd.f32 %v950_v36, %v949_v34 }
 0x32b   :  { %v952_v40 = vrot.slane %v951_v38, 2 }
 0x32d   :  { %v953_v43 = vadd.f32 %v952_v40, %v951_v38 }
 0x32f   :  { %v954_v42 = vrot.slane %v953_v43, 1 }
 0x331   :  { %v955_v49 = vadd.f32 %v954_v42, %v953_v43 }
 0x333   :  { %v963_v51 = vadd.f32 %v962_v44, %v955_v49 }
 0x335   :  { %964 = vst [vmem:[#allocation3] sm:$0x1] %v963_v51 }
 0x336   :  { %975 = dma.vmem_to_hbm [thread:$0]  %s971_s14, 16, %s973_s17, [#allocation4]  }
 0x337   :  { %1090 = dma.done.wait [#allocation4], 16  }
 0x338   :  { %1091 = vsyncadd [#allocation4], 4294967280 }
 0x339   :  { %980 = vsyncpa [#allocation4], 1 }

// kernel: tpu_custom_call.1
= control target key start
LH: loop header
LB: loop body
LE: loop exit
PB: predicated region body
PF: predicated region fallthrough
CT: control target
= control target key end

     0   :  { %s1630_s0 = inlined_call_operand.vmem [shape: f32[128,32], index: 0, kind: input, shape index: {}]   ;;  %s1631_s1 = inlined_call_operand.vmem [shape: f32[128,32], index: 1, kind: input, shape index: {}]   ;;  %s1632_s2 = inlined_call_operand.vmem [shape: f32[128,1], index: 2, kind: input, shape index: {}]   ;;  %s1633_s3 = inlined_call_operand.vmem [shape: f32[128,128], index: 3, kind: input, shape index: {}]   ;;  %s1634_s4 = inlined_call_operand.vmem [shape: f32[128,1], index: 4, kind: input, shape index: {}]   ;;  %s1635_s5 = inlined_call_operand.vmem [shape: f32[128,128], index: 5, kind: input, shape index: {}]   ;;  %s1636_s6 = inlined_call_operand.vmem [shape: f32[128,1], index: 6, kind: input, shape index: {}]   ;;  %s1637_s7 = inlined_call_operand.vmem [shape: f32[128,1], index: 7, kind: input, shape index: {}]   ;;  %s1638_s8 = inlined_call_operand.<no memory space> [shape: f32[1,1], index: 8, kind: input, shape index: {}]   ;;  %s1639_s9 = inlined_call_operand.hbm [shape: f32[1,128], index: 9, kind: output, shape index: {}]  }
   0x1   :  { %v14_v0 = vstv %s1638_s8 }
   0x2   :  { %15 = vst [vmem:[#allocation2] sm:$0x1] %v14_v0 }
   0x3   :  { %v66_v1 = vld [vmem:[%s1630_s0 + $0x78] sm:$0xff]  ;;  %vm163_vm0 = vcmask 261120   ;;  %v1092_v3 = vmov 0   ;;  %v80_v4 = vld [vmem:[%s1632_s2 + $0x68] sm:$0xff]  ;;  %v65_v6 = vld [vmem:[%s1630_s0 + $0x70] sm:$0xff] }
   0x4   :  { %v82_v2 = vld [vmem:[%s1632_s2 + $0x78] sm:$0xff]  ;;  %1065 = vset.pattern.permute.xlu2 %v1092_v3  ;;  %1064 = vset.pattern.permute.xlu1 %v1092_v3  ;;  %v64_v7 = vld [vmem:[%s1630_s0 + $0x68] sm:$0xff]  ;;  %v81_v8 = vld [vmem:[%s1632_s2 + $0x70] sm:$0xff] }
   0x5   :  { %v78_v5 = vld [vmem:[%s1632_s2 + $0x58] sm:$0xff]  ;;  %1063 = vset.pattern.permute.xlu0 %v1092_v3  ;;  %981 = vmatpush.xpose.msk.msra.mxu0 %vm163_vm0, %v66_v1 }
   0x6   :  { %1013 = vmatpush.xpose.msk.msra.mxu3 %vm163_vm0, %v66_v1  ;;  %160 = vperm.xlu0 %1063, %v82_v2  }
   0x7   :  { %150 = vperm.xlu1 %1064, %v80_v4   ;;  %140 = vperm.xlu2 %1065, %v78_v5  }
   0x9   :  { %982 = vmatpush.xpose.msk.msra.mxu0 %vm163_vm0, %v65_v6 }
   0xa   :  { %1014 = vmatpush.xpose.msk.msra.mxu3 %vm163_vm0, %v65_v6 }
   0xb   :  { %16 = vsyncpa [#allocation4], 0  ;;  %v79_v9 = vld [vmem:[%s1632_s2 + $0x60] sm:$0xff]  ;;  %v77_v10 = vld [vmem:[%s1632_s2 + $0x50] sm:$0xff]  ;;  %s972_s17 = sshll.u32 %s1639_s9, 4  ;;  %s973_s17 = int_to_ptr.hbm [resolvable:$true] %s972_s17 }
   0xc   :  { %v63_v11 = vld [vmem:[%s1630_s0 + $0x60] sm:$0xff]  ;;  %v62_v12 = vld [vmem:[%s1630_s0 + $0x58] sm:$0xff]  ;;  %v76_v13 = vld [vmem:[%s1632_s2 + $0x48] sm:$0xff] }
   0xd   :  { %983 = vmatpush.xpose.msk.msra.mxu0 %vm163_vm0, %v64_v7  ;;  %v75_v14 = vld [vmem:[%s1632_s2 + $0x40] sm:$0xff]  ;;  %v74_v15 = vld [vmem:[%s1632_s2 + $0x38] sm:$0xff]  ;;  %v61_v16 = vld [vmem:[%s1630_s0 + $0x50] sm:$0xff] }
   0xe   :  { %1015 = vmatpush.xpose.msk.msra.mxu3 %vm163_vm0, %v64_v7  ;;  %155 = vperm.xlu0 %1063, %v81_v8   ;;  %v60_v17 = vld [vmem:[%s1630_s0 + $0x48] sm:$0xff]  ;;  %v73_v18 = vld [vmem:[%s1632_s2 + $0x30] sm:$0xff]  ;;  %v71_v20 = vld [vmem:[%s1632_s2 + $0x20] sm:$0xff] }
   0xf   :  { %145 = vperm.xlu1 %1064, %v79_v9   ;;  %135 = vperm.xlu2 %1065, %v77_v10   ;;  %v72_v19 = vld [vmem:[%s1632_s2 + $0x28] sm:$0xff]  ;;  %v59_v21 = vld [vmem:[%s1630_s0 + $0x40] sm:$0xff]  ;;  %v58_v22 = vld [vmem:[%s1630_s0 + $0x38] sm:$0xff] }
  0x10   :  { %v70_v23 = vld [vmem:[%s1632_s2 + $0x18] sm:$0xff]  ;;  %v69_v24 = vld [vmem:[%s1632_s2 + $0x10] sm:$0xff]  ;;  %v68_v25 = vld [vmem:[%s1632_s2 + $0x8] sm:$0xff] }
  0x11   :  { %984 = vmatpush.xpose.msk.msra.mxu0 %vm163_vm0, %v63_v11  ;;  %v57_v26 = vld [vmem:[%s1630_s0 + $0x30] sm:$0xff]  ;;  %v56_v27 = vld [vmem:[%s1630_s0 + $0x28] sm:$0xff]  ;;  %v67_v28 = vld [vmem:[%s1632_s2] sm:$0xff] }
  0x12   :  { %1016 = vmatpush.xpose.msk.msra.mxu3 %vm163_vm0, %v63_v11  ;;  %v404_v29 = vld [vmem:[%s1634_s4 + $0x78] sm:$0xff]  ;;  %v403_v30 = vld [vmem:[%s1634_s4 + $0x70] sm:$0xff]  ;;  %v55_v31 = vld [vmem:[%s1630_s0 + $0x20] sm:$0xff] }
  0x13   :  { %v54_v32 = vld [vmem:[%s1630_s0 + $0x18] sm:$0xff]  ;;  %v402_v33 = vld [vmem:[%s1634_s4 + $0x68] sm:$0xff]  ;;  %v401_v34 = vld [vmem:[%s1634_s4 + $0x60] sm:$0xff] }
  0x14   :  { %v400_v35 = vld [vmem:[%s1634_s4 + $0x58] sm:$0xff]  ;;  %v53_v36 = vld [vmem:[%s1630_s0 + $0x10] sm:$0xff]  ;;  %v52_v37 = vld [vmem:[%s1630_s0 + $0x8] sm:$0xff] }
  0x15   :  { %985 = vmatpush.xpose.msk.msra.mxu0 %vm163_vm0, %v62_v12  ;;  %v399_v38 = vld [vmem:[%s1634_s4 + $0x50] sm:$0xff]  ;;  %v398_v39 = vld [vmem:[%s1634_s4 + $0x48] sm:$0xff]  ;;  %v397_v40 = vld [vmem:[%s1634_s4 + $0x40] sm:$0xff] }
  0x16   :  { %1017 = vmatpush.xpose.msk.msra.mxu3 %vm163_vm0, %v62_v12  ;;  %130 = vperm.xlu0 %1063, %v76_v13   ;;  %v51_v41 = vld [vmem:[%s1630_s0] sm:$0xff]  ;;  %v45_v43 = vld [vmem:[%s1631_s1 + $0x50] sm:$0xff]  ;;  %v396_v44 = vld [vmem:[%s1634_s4 + $0x38] sm:$0xff] }
  0x17   :  { %125 = vperm.xlu1 %1064, %v75_v14   ;;  %120 = vperm.xlu2 %1065, %v74_v15   ;;  %v35_v42 = vld [vmem:[%s1631_s1] sm:$0xff]  ;;  %v395_v45 = vld [vmem:[%s1634_s4 + $0x30] sm:$0xff]  ;;  %v394_v46 = vld [vmem:[%s1634_s4 + $0x28] sm:$0xff] }
  0x18   :  { %v36_v47 = vld [vmem:[%s1631_s1 + $0x8] sm:$0xff]  ;;  %v46_v48 = vld [vmem:[%s1631_s1 + $0x58] sm:$0xff]  ;;  %v393_v49 = vld [vmem:[%s1634_s4 + $0x20] sm:$0xff] }
  0x19   :  { %986 = vmatpush.xpose.msk.msra.mxu0 %vm163_vm0, %v61_v16  ;;  %v392_v50 = vld [vmem:[%s1634_s4 + $0x18] sm:$0xff]  ;;  %v391_v51 = vld [vmem:[%s1634_s4 + $0x10] sm:$0xff]  ;;  %v47_v53 = vld [vmem:[%s1631_s1 + $0x60] sm:$0xff] }
  0x1a   :  { %1018 = vmatpush.xpose.msk.msra.mxu3 %vm163_vm0, %v61_v16  ;;  %v37_v52 = vld [vmem:[%s1631_s1 + $0x10] sm:$0xff]  ;;  %v390_v54 = vld [vmem:[%s1634_s4 + $0x8] sm:$0xff]  ;;  %v389_v55 = vld [vmem:[%s1634_s4] sm:$0xff] }
  0x1b   :  { %v614_v56 = vld [vmem:[%s1636_s6] sm:$0xff]  ;;  %v38_v57 = vld [vmem:[%s1631_s1 + $0x18] sm:$0xff]  ;;  %v48_v58 = vld [vmem:[%s1631_s1 + $0x68] sm:$0xff] }
  0x1c   :  { %v615_v59 = vld [vmem:[%s1636_s6 + $0x8] sm:$0xff]  ;;  %v616_v60 = vld [vmem:[%s1636_s6 + $0x10] sm:$0xff]  ;;  %v617_v61 = vld [vmem:[%s1636_s6 + $0x18] sm:$0xff] }
  0x1d   :  { %987 = vmatpush.xpose.msk.msra.mxu0 %vm163_vm0, %v60_v17  ;;  %v39_v62 = vld [vmem:[%s1631_s1 + $0x20] sm:$0xff]  ;;  %v49_v63 = vld [vmem:[%s1631_s1 + $0x70] sm:$0xff]  ;;  %v619_v1 = vld [vmem:[%s1636_s6 + $0x28] sm:$0xff] }
  0x1e   :  { %1019 = vmatpush.xpose.msk.msra.mxu3 %vm163_vm0, %v60_v17  ;;  %115 = vperm.xlu0 %1063, %v73_v18   ;;  %v618_v0 = vld [vmem:[%s1636_s6 + $0x20] sm:$0xff]  ;;  %v620_v2 = vld [vmem:[%s1636_s6 + $0x30] sm:$0xff]  ;;  %v40_v3 = vld [vmem:[%s1631_s1 + $0x28] sm:$0xff] }
  0x1f   :  { %110 = vperm.xlu1 %1064, %v72_v19   ;;  %105 = vperm.xlu2 %1065, %v71_v20   ;;  %v50_v4 = vld [vmem:[%s1631_s1 + $0x78] sm:$0xff]  ;;  %v622_v6 = vld [vmem:[%s1636_s6 + $0x40] sm:$0xff]  ;;  %v623_v7 = vld [vmem:[%s1636_s6 + $0x48] sm:$0xff] }
  0x20   :  { %v621_v5 = vld [vmem:[%s1636_s6 + $0x38] sm:$0xff]  ;;  %v41_v8 = vld [vmem:[%s1631_s1 + $0x30] sm:$0xff]  ;;  %v626_v11 = vld [vmem:[%s1636_s6 + $0x60] sm:$0xff] }
  0x21   :  { %988 = vmatpush.xpose.msk.msra.mxu0 %vm163_vm0, %v59_v21  ;;  %v624_v9 = vld [vmem:[%s1636_s6 + $0x50] sm:$0xff]  ;;  %v625_v10 = vld [vmem:[%s1636_s6 + $0x58] sm:$0xff]  ;;  %v627_v13 = vld [vmem:[%s1636_s6 + $0x68] sm:$0xff] }
  0x22   :  { %1020 = vmatpush.xpose.msk.msra.mxu3 %vm163_vm0, %v59_v21  ;;  %v42_v12 = vld [vmem:[%s1631_s1 + $0x38] sm:$0xff]  ;;  %v628_v14 = vld [vmem:[%s1636_s6 + $0x70] sm:$0xff]  ;;  %v43_v16 = vld [vmem:[%s1631_s1 + $0x40] sm:$0xff] }
  0x23   :  { %v629_v15 = vld [vmem:[%s1636_s6 + $0x78] sm:$0xff]  ;;  %v823_v17 = vld [vmem:[%s1637_s7] sm:$0xff]  ;;  %v824_v18 = vld [vmem:[%s1637_s7 + $0x8] sm:$0xff] }
  0x24   :  { %v825_v19 = vld [vmem:[%s1637_s7 + $0x10] sm:$0xff]  ;;  %v44_v20 = vld [vmem:[%s1631_s1 + $0x48] sm:$0xff]  ;;  %v826_v21 = vld [vmem:[%s1637_s7 + $0x18] sm:$0xff] }
  0x25   :  { %989 = vmatpush.xpose.msk.msra.mxu0 %vm163_vm0, %v58_v22 }
  0x26   :  { %1021 = vmatpush.xpose.msk.msra.mxu3 %vm163_vm0, %v58_v22  ;;  %100 = vperm.xlu0 %1063, %v70_v23   ;;  %v827_v22 = vld [vmem:[%s1637_s7 + $0x20] sm:$0xff]  ;;  %v828_v23 = vld [vmem:[%s1637_s7 + $0x28] sm:$0xff] }
  0x27   :  { %95 = vperm.xlu1 %1064, %v69_v24   ;;  %90 = vperm.xlu2 %1065, %v68_v25   ;;  %v829_v24 = vld [vmem:[%s1637_s7 + $0x30] sm:$0xff]  ;;  %v830_v25 = vld [vmem:[%s1637_s7 + $0x38] sm:$0xff] }
  0x29   :  { %990 = vmatpush.xpose.msk.msra.mxu0 %vm163_vm0, %v57_v26 }
  0x2a   :  { %1022 = vmatpush.xpose.msk.msra.mxu3 %vm163_vm0, %v57_v26  ;;  %v831_v26 = vld [vmem:[%s1637_s7 + $0x40] sm:$0xff] }
  0x2d   :  { %991 = vmatpush.xpose.msk.msra.mxu0 %vm163_vm0, %v56_v27 }
  0x2e   :  { %1023 = vmatpush.xpose.msk.msra.mxu3 %vm163_vm0, %v56_v27  ;;  %85 = vperm.xlu0 %1063, %v67_v28   ;;  %v832_v27 = vld [vmem:[%s1637_s7 + $0x48] sm:$0xff]  ;;  %v833_v28 = vld [vmem:[%s1637_s7 + $0x50] sm:$0xff] }
  0x2f   :  { %482 = vperm.xlu1 %1064, %v404_v29   ;;  %477 = vperm.xlu2 %1065, %v403_v30   ;;  %v834_v29 = vld [vmem:[%s1637_s7 + $0x58] sm:$0xff]  ;;  %v835_v30 = vld [vmem:[%s1637_s7 + $0x60] sm:$0xff] }
  0x31   :  { %992 = vmatpush.xpose.msk.msra.mxu0 %vm163_vm0, %v55_v31 }
  0x32   :  { %1024 = vmatpush.xpose.msk.msra.mxu3 %vm163_vm0, %v55_v31  ;;  %v836_v31 = vld [vmem:[%s1637_s7 + $0x68] sm:$0xff] }
  0x35   :  { %993 = vmatpush.xpose.msk.msra.mxu0 %vm163_vm0, %v54_v32 }
  0x36   :  { %1025 = vmatpush.xpose.msk.msra.mxu3 %vm163_vm0, %v54_v32  ;;  %472 = vperm.xlu0 %1063, %v402_v33   ;;  %v837_v32 = vld [vmem:[%s1637_s7 + $0x70] sm:$0xff]  ;;  %v838_v33 = vld [vmem:[%s1637_s7 + $0x78] sm:$0xff] }
  0x37   :  { %467 = vperm.xlu1 %1064, %v401_v34   ;;  %462 = vperm.xlu2 %1065, %v400_v35   ;;  %v956_v34 = vld [vmem:[#allocation2] sm:$0x1] }
  0x39   :  { %994 = vmatpush.xpose.msk.msra.mxu0 %vm163_vm0, %v53_v36 }
  0x3a   :  { %1026 = vmatpush.xpose.msk.msra.mxu3 %vm163_vm0, %v53_v36 }
  0x3d   :  { %995 = vmatpush.xpose.msk.msra.mxu0 %vm163_vm0, %v52_v37 }
  0x3e   :  { %1027 = vmatpush.xpose.msk.msra.mxu3 %vm163_vm0, %v52_v37  ;;  %457 = vperm.xlu0 %1063, %v399_v38  }
  0x3f   :  { %452 = vperm.xlu1 %1064, %v398_v39   ;;  %447 = vperm.xlu2 %1065, %v397_v40  }
  0x41   :  { %996 = vmatpush.xpose.msk.msra.mxu0 %vm163_vm0, %v51_v41 }
  0x42   :  { %1028 = vmatpush.xpose.msk.msra.mxu3 %vm163_vm0, %v51_v41 }
  0x44   :  { %997 = vmatmul.msk.f32.vlgmr.msra.gmra.mxu0 %vm163_vm0, %v35_v42 }
  0x45   :  { %1007 = vmatmul.msk.f32.vlgmr.msra.gmra.mxu3 %vm163_vm0, %v45_v43 }
  0x46   :  { %442 = vperm.xlu0 %1063, %v396_v44  }
  0x47   :  { %437 = vperm.xlu1 %1064, %v395_v45   ;;  %432 = vperm.xlu2 %1065, %v394_v46  }
  0x4c   :  { %998 = vmatmul.msk.f32.gmra.mxu0 %vm163_vm0, %v36_v47 }
  0x4d   :  { %1008 = vmatmul.msk.f32.gmra.mxu3 %vm163_vm0, %v46_v48 }
  0x4e   :  { %427 = vperm.xlu0 %1063, %v393_v49  }
  0x4f   :  { %422 = vperm.xlu1 %1064, %v392_v50   ;;  %417 = vperm.xlu2 %1065, %v391_v51  }
  0x54   :  { %999 = vmatmul.msk.f32.gmra.mxu0 %vm163_vm0, %v37_v52 }
  0x55   :  { %1009 = vmatmul.msk.f32.gmra.mxu3 %vm163_vm0, %v47_v53 }
  0x56   :  { %412 = vperm.xlu0 %1063, %v390_v54  }
  0x57   :  { %407 = vperm.xlu1 %1064, %v389_v55   ;;  %632 = vperm.xlu2 %1065, %v614_v56  }
  0x5c   :  { %1000 = vmatmul.msk.f32.gmra.mxu0 %vm163_vm0, %v38_v57 }
  0x5d   :  { %1010 = vmatmul.msk.f32.gmra.mxu3 %vm163_vm0, %v48_v58 }
  0x5e   :  { %637 = vperm.xlu0 %1063, %v615_v59  }
  0x5f   :  { %642 = vperm.xlu1 %1064, %v616_v60   ;;  %647 = vperm.xlu2 %1065, %v617_v61  }
  0x61   :  { %v141_v48 = vpop.permute.xlu2 %140 }
  0x64   :  { %1001 = vmatmul.msk.f32.gmra.mxu0 %vm163_vm0, %v39_v62 }
  0x65   :  { %1011 = vmatmul.msk.f32.gmra.mxu3 %vm163_vm0, %v49_v63 }
  0x66   :  { %652 = vperm.xlu0 %1063, %v618_v0  }
  0x67   :  { %657 = vperm.xlu1 %1064, %v619_v1   ;;  %662 = vperm.xlu2 %1065, %v620_v2  }
  0x69   :  { %v136_v63 = vpop.permute.xlu2 %135 }
  0x6c   :  { %1002 = vmatmul.msk.f32.gmra.mxu0 %vm163_vm0, %v40_v3 }
  0x6d   :  { %1012 = vmatmul.msk.f32.gmra.mxu3 %vm163_vm0, %v50_v4 }
  0x6e   :  { %667 = vperm.xlu0 %1063, %v621_v5  }
  0x6f   :  { %672 = vperm.xlu1 %1064, %v622_v6   ;;  %677 = vperm.xlu2 %1065, %v623_v7  }
  0x74   :  { %1003 = vmatmul.msk.f32.gmra.mxu0 %vm163_vm0, %v41_v8 }
  0x76   :  { %682 = vperm.xlu0 %1063, %v624_v9  }
  0x77   :  { %687 = vperm.xlu1 %1064, %v625_v10   ;;  %692 = vperm.xlu2 %1065, %v626_v11   ;;  %v121_v11 = vpop.permute.xlu2 %120 }
  0x78   :  { %v161_v43 = vpop.permute.xlu0 %160 }
  0x79   :  { %v151_v45 = vpop.permute.xlu1 %150 }
  0x7c   :  { %1004 = vmatmul.msk.f32.gmra.mxu0 %vm163_vm0, %v42_v12 }
  0x7e   :  { %697 = vperm.xlu0 %1063, %v627_v13  }
  0x7f   :  { %702 = vperm.xlu1 %1064, %v628_v14   ;;  %707 = vperm.xlu2 %1065, %v629_v15  }
  0x80   :  { %v156_v49 = vpop.permute.xlu0 %155 }
  0x81   :  { %v146_v55 = vpop.permute.xlu1 %145 }
  0x84   :  { %1005 = vmatmul.msk.f32.gmra.mxu0 %vm163_vm0, %v43_v16 }
  0x86   :  { %841 = vperm.xlu0 %1063, %v823_v17  }
  0x87   :  { %846 = vperm.xlu1 %1064, %v824_v18   ;;  %851 = vperm.xlu2 %1065, %v825_v19   ;;  %v106_v19 = vpop.permute.xlu2 %105 }
  0x88   :  { %v131_v4 = vpop.permute.xlu0 %130 }
  0x89   :  { %v126_v10 = vpop.permute.xlu1 %125 }
  0x8c   :  { %1006 = vmatmul.msk.f32.gmra.mxu0 %vm163_vm0, %v44_v20 }
  0x8e   :  { %856 = vperm.xlu0 %1063, %v826_v21  }
  0x8f   :  { %861 = vperm.xlu1 %1064, %v827_v22   ;;  %866 = vperm.xlu2 %1065, %v828_v23  }
  0x90   :  { %v116_v13 = vpop.permute.xlu0 %115 }
  0x91   :  { %v111_v15 = vpop.permute.xlu1 %110 }
  0x96   :  { %871 = vperm.xlu0 %1063, %v829_v24  }
  0x97   :  { %876 = vperm.xlu1 %1064, %v830_v25   ;;  %881 = vperm.xlu2 %1065, %v831_v26  }
  0x98   :  { %v101_v23 = vpop.permute.xlu0 %100 }
  0x9e   :  { %886 = vperm.xlu0 %1063, %v832_v27  }
  0x9f   :  { %891 = vperm.xlu1 %1064, %v833_v28   ;;  %896 = vperm.xlu2 %1065, %v834_v29  }
  0xa6   :  { %901 = vperm.xlu0 %1063, %v835_v30  }
  0xa7   :  { %906 = vperm.xlu1 %1064, %v836_v31   ;;  %911 = vperm.xlu2 %1065, %v837_v32  }
  0xae   :  { %916 = vperm.xlu0 %1063, %v838_v33   ;;  %v96_v33 = vpop.permute.xlu1 %95 }
  0xaf   :  { %959 = vperm.xlu1 %1064, %v956_v34  }
  0xc1   :  { %v1483_v35 = vpop.f32.mrf.mxu0 }
  0xc8   :  { %v307_v36 = vpop.f32.mrf.mxu3 }
  0xc9   :  { %v1485_v37 = vpop.f32.mrf.mxu0  ;;  %v308_v0 = vadd.f32 %v307_v36, %v136_v63  ;;  %v383_v63 = vld [vmem:[%s1633_s3 + $0x50] sm:$0xff] }
  0xcb   :  { %v351_v7 = vmul.f32 0.2, %v308_v0  ;;  %vm335_vm6 = vcmp.gt.f32.partialorder %v308_v0, 0.0 }
  0xcd   :  { %v367_v9 = vsel %vm335_vm6, %v308_v0, %v351_v7  ;;  %v384_v0 = vld [vmem:[%s1633_s3 + $0x58] sm:$0xff] }
  0xd0   :  { %v310_v38 = vpop.f32.mrf.mxu3 }
  0xd1   :  { %v1487_v39 = vpop.f32.mrf.mxu0  ;;  %v311_v59 = vadd.f32 %v310_v38, %v141_v48 }
  0xd2   :  { %v284_v34 = vadd.f32 %v1487_v39, %v96_v33 }
  0xd3   :  { %v352_v3 = vmul.f32 0.2, %v311_v59  ;;  %vm336_vm5 = vcmp.gt.f32.partialorder %v311_v59, 0.0 }
  0xd4   :  { %vm327_vm14 = vcmp.gt.f32.partialorder %v284_v34, 0.0 }
  0xd5   :  { %v368_v8 = vsel %vm336_vm5, %v311_v59, %v352_v3  ;;  %v379_v59 = vld [vmem:[%s1633_s3 + $0x30] sm:$0xff] }
  0xd8   :  { %v313_v40 = vpop.f32.mrf.mxu3 }
  0xd9   :  { %v1489_v41 = vpop.f32.mrf.mxu0  ;;  %v314_v57 = vadd.f32 %v313_v40, %v146_v55  ;;  %v91_v40 = vpop.permute.xlu2 %90  ;;  %v375_v55 = vld [vmem:[%s1633_s3 + $0x10] sm:$0xff] }
  0xda   :  { %v287_v30 = vadd.f32 %v1489_v41, %v101_v23 }
  0xdb   :  { %v353_v1 = vmul.f32 0.2, %v314_v57  ;;  %vm337_vm4 = vcmp.gt.f32.partialorder %v314_v57, 0.0 }
  0xdc   :  { %vm328_vm13 = vcmp.gt.f32.partialorder %v287_v30, 0.0 }
  0xdd   :  { %v369_v6 = vsel %vm337_vm4, %v314_v57, %v353_v1  ;;  %v377_v57 = vld [vmem:[%s1633_s3 + $0x20] sm:$0xff] }
  0xde   :  { %v385_v1 = vld [vmem:[%s1633_s3 + $0x60] sm:$0xff] }
  0xe0   :  { %v316_v42 = vpop.f32.mrf.mxu3 }
  0xe1   :  { %v1491_v44 = vpop.f32.mrf.mxu0  ;;  %v317_v52 = vadd.f32 %v316_v42, %v151_v45  ;;  %v281_v42 = vadd.f32 %v1485_v37, %v91_v40  ;;  %v86_v45 = vpop.permute.xlu0 %85 }
  0xe2   :  { %v290_v27 = vadd.f32 %v1491_v44, %v106_v19  ;;  %v344_v44 = vmul.f32 0.2, %v287_v30  ;;  %v278_v41 = vadd.f32 %v1483_v35, %v86_v45  ;;  %v373_v35 = vld [vmem:[%s1633_s3] sm:$0xff] }
  0xe3   :  { %v354_v62 = vmul.f32 0.2, %v317_v52  ;;  %vm338_vm3 = vcmp.gt.f32.partialorder %v317_v52, 0.0  ;;  %v342_v48 = vmul.f32 0.2, %v281_v42  ;;  %vm326_vm15 = vcmp.gt.f32.partialorder %v281_v42, 0.0 }
  0xe4   :  { %v345_v38 = vmul.f32 0.2, %v290_v27  ;;  %vm329_vm12 = vcmp.gt.f32.partialorder %v290_v27, 0.0  ;;  %v360_v39 = vsel %vm328_vm13, %v287_v30, %v344_v44  ;;  %v341_v37 = vmul.f32 0.2, %v278_v41 }
  0xe5   :  { %v370_v2 = vsel %vm338_vm3, %v317_v52, %v354_v62  ;;  %vm325_vm0 = vcmp.gt.f32.partialorder %v278_v41, 0.0  ;;  %v382_v62 = vld [vmem:[%s1633_s3 + $0x48] sm:$0xff] }
  0xe6   :  { %v357_v52 = vsel %vm325_vm0, %v278_v41, %v341_v37 }
  0xe8   :  { %v319_v46 = vpop.f32.mrf.mxu3 }
  0xe9   :  { %v292_v47 = vpop.f32.mrf.mxu0  ;;  %v320_v50 = vadd.f32 %v319_v46, %v156_v49  ;;  %v361_v46 = vsel %vm329_vm12, %v290_v27, %v345_v38 }
  0xea   :  { %v293_v24 = vadd.f32 %v292_v47, %v111_v15  ;;  %v343_v47 = vmul.f32 0.2, %v284_v34 }
  0xeb   :  { %v355_v54 = vmul.f32 0.2, %v320_v50  ;;  %vm339_vm1 = vcmp.gt.f32.partialorder %v320_v50, 0.0 }
  0xec   :  { %v346_v32 = vmul.f32 0.2, %v293_v24  ;;  %vm330_vm11 = vcmp.gt.f32.partialorder %v293_v24, 0.0  ;;  %v359_v49 = vsel %vm327_vm14, %v284_v34, %v343_v47 }
  0xed   :  { %v371_v61 = vsel %vm339_vm1, %v320_v50, %v355_v54  ;;  %v358_v50 = vsel %vm326_vm15, %v281_v42, %v342_v48  ;;  %v388_v54 = vld [vmem:[%s1633_s3 + $0x78] sm:$0xff] }
  0xf0   :  { %v322_v51 = vpop.f32.mrf.mxu3 }
  0xf1   :  { %v323_v53 = vadd.f32 %v322_v51, %v161_v43  ;;  %v295_v56 = vpop.f32.mrf.mxu0  ;;  %v362_v43 = vsel %vm330_vm11, %v293_v24, %v346_v32  ;;  %v387_v51 = vld [vmem:[%s1633_s3 + $0x70] sm:$0xff]  ;;  %v473_v24 = vpop.permute.xlu0 %472 }
  0xf2   :  { %v296_v20 = vadd.f32 %v295_v56, %v116_v13  ;;  %v376_v56 = vld [vmem:[%s1633_s3 + $0x18] sm:$0xff] }
  0xf3   :  { %vm340_vm2 = vcmp.gt.f32.partialorder %v323_v53, 0.0  ;;  %v356_v58 = vmul.f32 0.2, %v323_v53 }
  0xf4   :  { %v347_v29 = vmul.f32 0.2, %v296_v20  ;;  %vm331_vm10 = vcmp.gt.f32.partialorder %v296_v20, 0.0 }
  0xf5   :  { %v372_v60 = vsel %vm340_vm2, %v323_v53, %v356_v58  ;;  %v374_v53 = vld [vmem:[%s1633_s3 + $0x8] sm:$0xff] }
  0xf6   :  { %485 = vmatpush.msra.mxu1 %v372_v60  ;;  %1029 = vmatpush.msrb.mxu3 %v372_v60  ;;  %v363_v36 = vsel %vm331_vm10, %v296_v20, %v347_v29  ;;  %v378_v58 = vld [vmem:[%s1633_s3 + $0x28] sm:$0xff]  ;;  %v380_v60 = vld [vmem:[%s1633_s3 + $0x38] sm:$0xff] }
  0xf8   :  { %486 = vmatpush.msra.mxu1 %v371_v61  ;;  %1030 = vmatpush.msrb.mxu3 %v371_v61  ;;  %v381_v61 = vld [vmem:[%s1633_s3 + $0x40] sm:$0xff] }
  0xf9   :  { %v298_v5 = vpop.f32.mrf.mxu0 }
  0xfa   :  { %487 = vmatpush.msra.mxu1 %v370_v2  ;;  %1031 = vmatpush.msrb.mxu3 %v370_v2  ;;  %v299_v17 = vadd.f32 %v298_v5, %v121_v11  ;;  %v386_v2 = vld [vmem:[%s1633_s3 + $0x68] sm:$0xff] }
  0xfc   :  { %488 = vmatpush.msra.mxu1 %v369_v6  ;;  %1032 = vmatpush.msrb.mxu3 %v369_v6  ;;  %v348_v26 = vmul.f32 0.2, %v299_v17  ;;  %vm332_vm9 = vcmp.gt.f32.partialorder %v299_v17, 0.0  ;;  %v478_v6 = vpop.permute.xlu2 %477 }
  0xfe   :  { %489 = vmatpush.msra.mxu1 %v368_v8  ;;  %1033 = vmatpush.msrb.mxu3 %v368_v8  ;;  %v364_v31 = vsel %vm332_vm9, %v299_v17, %v348_v26  ;;  %v483_v8 = vpop.permute.xlu1 %482 }
 0x100   :  { %490 = vmatpush.msra.mxu1 %v367_v9  ;;  %1034 = vmatpush.msrb.mxu3 %v367_v9 }
 0x101   :  { %v301_v12 = vpop.f32.mrf.mxu0 }
 0x102   :  { %v302_v14 = vadd.f32 %v301_v12, %v126_v10 }
 0x104   :  { %v349_v22 = vmul.f32 0.2, %v302_v14  ;;  %vm333_vm8 = vcmp.gt.f32.partialorder %v302_v14, 0.0  ;;  %v463_v27 = vpop.permute.xlu2 %462 }
 0x106   :  { %v365_v28 = vsel %vm333_vm8, %v302_v14, %v349_v22 }
 0x109   :  { %v304_v16 = vpop.f32.mrf.mxu0 }
 0x10a   :  { %v305_v18 = vadd.f32 %v304_v16, %v131_v4 }
 0x10c   :  { %vm334_vm7 = vcmp.gt.f32.partialorder %v305_v18, 0.0  ;;  %v350_v21 = vmul.f32 0.2, %v305_v18 }
 0x10e   :  { %v366_v25 = vsel %vm334_vm7, %v305_v18, %v350_v21 }
 0x10f   :  { %491 = vmatpush.msra.mxu1 %v366_v25  ;;  %1035 = vmatpush.msrb.mxu3 %v366_v25  ;;  %v468_v25 = vpop.permute.xlu1 %467 }
 0x111   :  { %492 = vmatpush.msra.mxu1 %v365_v28  ;;  %1036 = vmatpush.msrb.mxu3 %v365_v28  ;;  %v458_v28 = vpop.permute.xlu0 %457 }
 0x113   :  { %493 = vmatpush.msra.mxu1 %v364_v31  ;;  %1037 = vmatpush.msrb.mxu3 %v364_v31  ;;  %v448_v31 = vpop.permute.xlu2 %447 }
 0x115   :  { %494 = vmatpush.msra.mxu1 %v363_v36  ;;  %1038 = vmatpush.msrb.mxu3 %v363_v36 }
 0x117   :  { %495 = vmatpush.msra.mxu1 %v362_v43  ;;  %1039 = vmatpush.msrb.mxu3 %v362_v43  ;;  %v453_v29 = vpop.permute.xlu1 %452 }
 0x119   :  { %496 = vmatpush.msra.mxu1 %v361_v46  ;;  %1040 = vmatpush.msrb.mxu3 %v361_v46  ;;  %v443_v33 = vpop.permute.xlu0 %442 }
 0x11b   :  { %497 = vmatpush.msra.mxu1 %v360_v39  ;;  %1041 = vmatpush.msrb.mxu3 %v360_v39 }
 0x11d   :  { %498 = vmatpush.msra.mxu1 %v359_v49  ;;  %1042 = vmatpush.msrb.mxu3 %v359_v49  ;;  %v433_v49 = vpop.permute.xlu2 %432 }
 0x11f   :  { %499 = vmatpush.msra.mxu1 %v358_v50  ;;  %1043 = vmatpush.msrb.mxu3 %v358_v50  ;;  %v438_v40 = vpop.permute.xlu1 %437 }
 0x121   :  { %500 = vmatpush.msra.mxu1 %v357_v52  ;;  %1044 = vmatpush.msrb.mxu3 %v357_v52 }
 0x122   :  { %501 = vmatmul.f32.vlgmr.msra.gmra.mxu1 %v373_v35  ;;  %543 = vmatmul.f32.vlgmr.msrb.gmra.mxu3 %v387_v51  ;;  %v428_v51 = vpop.permute.xlu0 %427 }
 0x12a   :  { %504 = vmatmul.f32.gmra.mxu1 %v374_v53  ;;  %546 = vmatmul.f32.gmra.mxu3 %v388_v54 }
 0x132   :  { %507 = vmatmul.f32.gmra.mxu1 %v375_v55  ;;  %v423_v55 = vpop.permute.xlu1 %422 }
 0x13a   :  { %510 = vmatmul.f32.gmra.mxu1 %v376_v56 }
 0x142   :  { %513 = vmatmul.f32.gmra.mxu1 %v377_v57 }
 0x14a   :  { %516 = vmatmul.f32.gmra.mxu1 %v378_v58 }
 0x152   :  { %519 = vmatmul.f32.gmra.mxu1 %v379_v59 }
 0x15a   :  { %522 = vmatmul.f32.gmra.mxu1 %v380_v60 }
 0x162   :  { %525 = vmatmul.f32.gmra.mxu1 %v381_v61 }
 0x16a   :  { %528 = vmatmul.f32.gmra.mxu1 %v382_v62 }
 0x172   :  { %531 = vmatmul.f32.gmra.mxu1 %v383_v63 }
 0x17a   :  { %534 = vmatmul.f32.gmra.mxu1 %v384_v0 }
 0x182   :  { %537 = vmatmul.f32.gmra.mxu1 %v385_v1  ;;  %v418_v1 = vpop.permute.xlu2 %417 }
 0x18a   :  { %540 = vmatmul.f32.gmra.mxu1 %v386_v2 }
 0x19f   :  { %v1546_v3 = vpop.f32.mrf.mxu1 }
 0x1a5   :  { %v544_v4 = vpop.f32.mrf.mxu3 }
 0x1a6   :  { %v545_v7 = vadd.f32 %v544_v4, %v478_v6 }
 0x1a7   :  { %v1548_v5 = vpop.f32.mrf.mxu1 }
 0x1a8   :  { %v580_v13 = vmul.f32 0.2, %v545_v7  ;;  %vm564_vm2 = vcmp.gt.f32.partialorder %v545_v7, 0.0 }
 0x1aa   :  { %v596_v15 = vsel %vm564_vm2, %v545_v7, %v580_v13  ;;  %v413_v7 = vpop.permute.xlu0 %412 }
 0x1ad   :  { %v547_v9 = vpop.f32.mrf.mxu3 }
 0x1ae   :  { %v548_v10 = vadd.f32 %v547_v9, %v483_v8  ;;  %v506_v8 = vadd.f32 %v1548_v5, %v413_v7 }
 0x1af   :  { %v1550_v11 = vpop.f32.mrf.mxu1 }
 0x1b0   :  { %vm565_vm1 = vcmp.gt.f32.partialorder %v548_v10, 0.0  ;;  %v581_v12 = vmul.f32 0.2, %v548_v10  ;;  %v509_v2 = vadd.f32 %v1550_v11, %v418_v1  ;;  %vm551_vm15 = vcmp.gt.f32.partialorder %v506_v8, 0.0 }
 0x1b2   :  { %v597_v14 = vsel %vm565_vm1, %v548_v10, %v581_v12  ;;  %v408_v12 = vpop.permute.xlu1 %407  ;;  %vm552_vm14 = vcmp.gt.f32.partialorder %v509_v2, 0.0 }
 0x1b3   :  { %710 = vmatpush.msra.mxu2 %v597_v14  ;;  %1045 = vmatpush.msra.mxu3 %v597_v14  ;;  %v503_v13 = vadd.f32 %v1546_v3, %v408_v12  ;;  %v598_v3 = vld [vmem:[%s1635_s5] sm:$0xff] }
 0x1b5   :  { %711 = vmatpush.msra.mxu2 %v596_v15  ;;  %1046 = vmatpush.msra.mxu3 %v596_v15  ;;  %v568_v15 = vmul.f32 0.2, %v509_v2  ;;  %v566_v5 = vmul.f32 0.2, %v503_v13  ;;  %vm550_vm0 = vcmp.gt.f32.partialorder %v503_v13, 0.0 }
 0x1b7   :  { %v1552_v16 = vpop.f32.mrf.mxu1 }
 0x1b8   :  { %v512_v62 = vadd.f32 %v1552_v16, %v423_v55  ;;  %v567_v16 = vmul.f32 0.2, %v506_v8 }
 0x1ba   :  { %v569_v10 = vmul.f32 0.2, %v512_v62  ;;  %vm553_vm13 = vcmp.gt.f32.partialorder %v512_v62, 0.0 }
 0x1bc   :  { %v585_v11 = vsel %vm553_vm13, %v512_v62, %v569_v10 }
 0x1bf   :  { %v514_v17 = vpop.f32.mrf.mxu1 }
 0x1c0   :  { %v515_v59 = vadd.f32 %v514_v17, %v428_v51  ;;  %v584_v17 = vsel %vm552_vm14, %v509_v2, %v568_v15 }
 0x1c2   :  { %v570_v6 = vmul.f32 0.2, %v515_v59  ;;  %vm554_vm12 = vcmp.gt.f32.partialorder %v515_v59, 0.0 }
 0x1c4   :  { %v586_v14 = vsel %vm554_vm12, %v515_v59, %v570_v6 }
 0x1c7   :  { %v517_v18 = vpop.f32.mrf.mxu1 }
 0x1c8   :  { %v518_v56 = vadd.f32 %v517_v18, %v433_v49  ;;  %v583_v18 = vsel %vm551_vm15, %v506_v8, %v567_v16 }
 0x1ca   :  { %v571_v0 = vmul.f32 0.2, %v518_v56  ;;  %vm555_vm11 = vcmp.gt.f32.partialorder %v518_v56, 0.0 }
 0x1cc   :  { %v587_v9 = vsel %vm555_vm11, %v518_v56, %v571_v0 }
 0x1cf   :  { %v520_v19 = vpop.f32.mrf.mxu1 }
 0x1d0   :  { %v521_v52 = vadd.f32 %v520_v19, %v438_v40  ;;  %v613_v19 = vld [vmem:[%s1635_s5 + $0x78] sm:$0xff] }
 0x1d2   :  { %v572_v61 = vmul.f32 0.2, %v521_v52  ;;  %vm556_vm10 = vcmp.gt.f32.partialorder %v521_v52, 0.0 }
 0x1d4   :  { %v588_v4 = vsel %vm556_vm10, %v521_v52, %v572_v61 }
 0x1d7   :  { %v523_v20 = vpop.f32.mrf.mxu1 }
 0x1d8   :  { %v524_v37 = vadd.f32 %v523_v20, %v443_v33  ;;  %v582_v20 = vsel %vm550_vm0, %v503_v13, %v566_v5  ;;  %v610_v33 = vld [vmem:[%s1635_s5 + $0x60] sm:$0xff] }
 0x1da   :  { %v573_v58 = vmul.f32 0.2, %v524_v37  ;;  %vm557_vm9 = vcmp.gt.f32.partialorder %v524_v37, 0.0 }
 0x1dc   :  { %v589_v63 = vsel %vm557_vm9, %v524_v37, %v573_v58 }
 0x1df   :  { %v526_v21 = vpop.f32.mrf.mxu1 }
 0x1e0   :  { %v527_v47 = vadd.f32 %v526_v21, %v448_v31  ;;  %v599_v21 = vld [vmem:[%s1635_s5 + $0x8] sm:$0xff]  ;;  %v609_v31 = vld [vmem:[%s1635_s5 + $0x58] sm:$0xff] }
 0x1e2   :  { %v574_v54 = vmul.f32 0.2, %v527_v47  ;;  %vm558_vm8 = vcmp.gt.f32.partialorder %v527_v47, 0.0 }
 0x1e4   :  { %v590_v60 = vsel %vm558_vm8, %v527_v47, %v574_v54 }
 0x1e7   :  { %v529_v22 = vpop.f32.mrf.mxu1 }
 0x1e8   :  { %v530_v45 = vadd.f32 %v529_v22, %v453_v29  ;;  %v600_v22 = vld [vmem:[%s1635_s5 + $0x10] sm:$0xff]  ;;  %v607_v29 = vld [vmem:[%s1635_s5 + $0x48] sm:$0xff] }
 0x1ea   :  { %v575_v35 = vmul.f32 0.2, %v530_v45  ;;  %vm559_vm7 = vcmp.gt.f32.partialorder %v530_v45, 0.0 }
 0x1ec   :  { %v591_v57 = vsel %vm559_vm7, %v530_v45, %v575_v35 }
 0x1ef   :  { %v532_v23 = vpop.f32.mrf.mxu1 }
 0x1f0   :  { %v533_v42 = vadd.f32 %v532_v23, %v458_v28  ;;  %v601_v23 = vld [vmem:[%s1635_s5 + $0x18] sm:$0xff]  ;;  %v606_v28 = vld [vmem:[%s1635_s5 + $0x40] sm:$0xff] }
 0x1f2   :  { %v576_v48 = vmul.f32 0.2, %v533_v42  ;;  %vm560_vm6 = vcmp.gt.f32.partialorder %v533_v42, 0.0 }
 0x1f4   :  { %v592_v53 = vsel %vm560_vm6, %v533_v42, %v576_v48 }
 0x1f7   :  { %v535_v26 = vpop.f32.mrf.mxu1 }
 0x1f8   :  { %v536_v36 = vadd.f32 %v535_v26, %v463_v27  ;;  %v604_v26 = vld [vmem:[%s1635_s5 + $0x30] sm:$0xff]  ;;  %v605_v27 = vld [vmem:[%s1635_s5 + $0x38] sm:$0xff] }
 0x1fa   :  { %v577_v46 = vmul.f32 0.2, %v536_v36  ;;  %vm561_vm5 = vcmp.gt.f32.partialorder %v536_v36, 0.0 }
 0x1fc   :  { %v593_v50 = vsel %vm561_vm5, %v536_v36, %v577_v46  ;;  %v638_v36 = vpop.permute.xlu0 %637 }
 0x1ff   :  { %v538_v30 = vpop.f32.mrf.mxu1 }
 0x200   :  { %v539_v32 = vadd.f32 %v538_v30, %v468_v25  ;;  %v603_v25 = vld [vmem:[%s1635_s5 + $0x28] sm:$0xff]  ;;  %v608_v30 = vld [vmem:[%s1635_s5 + $0x50] sm:$0xff] }
 0x202   :  { %v578_v44 = vmul.f32 0.2, %v539_v32  ;;  %vm562_vm4 = vcmp.gt.f32.partialorder %v539_v32, 0.0 }
 0x204   :  { %v594_v39 = vsel %vm562_vm4, %v539_v32, %v578_v44  ;;  %v633_v32 = vpop.permute.xlu2 %632  ;;  %v612_v44 = vld [vmem:[%s1635_s5 + $0x70] sm:$0xff] }
 0x207   :  { %v541_v34 = vpop.f32.mrf.mxu1 }
 0x208   :  { %v542_v38 = vadd.f32 %v541_v34, %v473_v24  ;;  %v602_v24 = vld [vmem:[%s1635_s5 + $0x20] sm:$0xff]  ;;  %v643_v34 = vpop.permute.xlu1 %642 }
 0x20a   :  { %vm563_vm3 = vcmp.gt.f32.partialorder %v542_v38, 0.0  ;;  %v579_v43 = vmul.f32 0.2, %v542_v38 }
 0x20c   :  { %v595_v41 = vsel %vm563_vm3, %v542_v38, %v579_v43  ;;  %v611_v38 = vld [vmem:[%s1635_s5 + $0x68] sm:$0xff]  ;;  %v648_v40 = vpop.permute.xlu2 %647  ;;  %v653_v43 = vpop.permute.xlu0 %652  ;;  %s1093_s5 = smov [#allocation3]  }
 0x20d   :  { %712 = vmatpush.msra.mxu2 %v595_v41  ;;  %1047 = vmatpush.msra.mxu3 %v595_v41  ;;  %s970_s14 = sshll.u32 %s1093_s5, 4  ;;  %s971_s14 = int_to_ptr.vmem [resolvable:$true] %s970_s14 }
 0x20f   :  { %713 = vmatpush.msra.mxu2 %v594_v39  ;;  %1048 = vmatpush.msra.mxu3 %v594_v39 }
 0x210   :  { %v658_v42 = vpop.permute.xlu1 %657 }
 0x211   :  { %714 = vmatpush.msra.mxu2 %v593_v50  ;;  %1049 = vmatpush.msra.mxu3 %v593_v50 }
 0x213   :  { %715 = vmatpush.msra.mxu2 %v592_v53  ;;  %1050 = vmatpush.msra.mxu3 %v592_v53 }
 0x214   :  { %v663_v45 = vpop.permute.xlu2 %662  ;;  %v668_v46 = vpop.permute.xlu0 %667 }
 0x215   :  { %716 = vmatpush.msra.mxu2 %v591_v57  ;;  %1051 = vmatpush.msra.mxu3 %v591_v57 }
 0x217   :  { %717 = vmatpush.msra.mxu2 %v590_v60  ;;  %1052 = vmatpush.msra.mxu3 %v590_v60 }
 0x218   :  { %v673_v41 = vpop.permute.xlu1 %672 }
 0x219   :  { %718 = vmatpush.msra.mxu2 %v589_v63  ;;  %1053 = vmatpush.msra.mxu3 %v589_v63 }
 0x21b   :  { %719 = vmatpush.msra.mxu2 %v588_v4  ;;  %1054 = vmatpush.msra.mxu3 %v588_v4 }
 0x21c   :  { %v1606_v47 = vpop.permute.xlu2 %677  ;;  %v1610_v48 = vpop.permute.xlu0 %682 }
 0x21d   :  { %720 = vmatpush.msra.mxu2 %v587_v9  ;;  %1055 = vmatpush.msra.mxu3 %v587_v9 }
 0x21f   :  { %721 = vmatpush.msra.mxu2 %v586_v14  ;;  %1056 = vmatpush.msra.mxu3 %v586_v14 }
 0x220   :  { %v1608_v39 = vpop.permute.xlu1 %687 }
 0x221   :  { %722 = vmatpush.msra.mxu2 %v585_v11  ;;  %1057 = vmatpush.msra.mxu3 %v585_v11 }
 0x223   :  { %723 = vmatpush.msra.mxu2 %v584_v17  ;;  %1058 = vmatpush.msra.mxu3 %v584_v17 }
 0x224   :  { %v1612_v37 = vpop.permute.xlu2 %692  ;;  %v1616_v35 = vpop.permute.xlu0 %697 }
 0x225   :  { %724 = vmatpush.msra.mxu2 %v583_v18  ;;  %1059 = vmatpush.msra.mxu3 %v583_v18 }
 0x227   :  { %725 = vmatpush.msra.mxu2 %v582_v20  ;;  %1060 = vmatpush.msra.mxu3 %v582_v20 }
 0x228   :  { %726 = vmatmul.f32.vlgmr.msra.gmra.mxu2 %v598_v3  ;;  %771 = vmatmul.f32.vlgmr.msra.gmra.mxu3 %v613_v19  ;;  %v1614_v50 = vpop.permute.xlu1 %702 }
 0x22c   :  { %v1618_v55 = vpop.permute.xlu2 %707  ;;  %v842_v59 = vpop.permute.xlu0 %841 }
 0x230   :  { %729 = vmatmul.f32.gmra.mxu2 %v599_v21  ;;  %v847_v58 = vpop.permute.xlu1 %846 }
 0x234   :  { %v852_v4 = vpop.permute.xlu2 %851  ;;  %v857_v13 = vpop.permute.xlu0 %856 }
 0x238   :  { %732 = vmatmul.f32.gmra.mxu2 %v600_v22  ;;  %v862_v21 = vpop.permute.xlu1 %861 }
 0x240   :  { %735 = vmatmul.f32.gmra.mxu2 %v601_v23  ;;  %v867_v23 = vpop.permute.xlu2 %866 }
 0x248   :  { %738 = vmatmul.f32.gmra.mxu2 %v602_v24 }
 0x250   :  { %741 = vmatmul.f32.gmra.mxu2 %v603_v25 }
 0x258   :  { %744 = vmatmul.f32.gmra.mxu2 %v604_v26  ;;  %v872_v26 = vpop.permute.xlu0 %871 }
 0x260   :  { %747 = vmatmul.f32.gmra.mxu2 %v605_v27 }
 0x268   :  { %750 = vmatmul.f32.gmra.mxu2 %v606_v28 }
 0x270   :  { %753 = vmatmul.f32.gmra.mxu2 %v607_v29 }
 0x278   :  { %756 = vmatmul.f32.gmra.mxu2 %v608_v30 }
 0x280   :  { %759 = vmatmul.f32.gmra.mxu2 %v609_v31  ;;  %v877_v31 = vpop.permute.xlu1 %876 }
 0x288   :  { %762 = vmatmul.f32.gmra.mxu2 %v610_v33 }
 0x290   :  { %765 = vmatmul.f32.gmra.mxu2 %v611_v38 }
 0x298   :  { %768 = vmatmul.f32.gmra.mxu2 %v612_v44  ;;  %v882_v44 = vpop.permute.xlu2 %881 }
 0x2ab   :  { %v727_v49 = vpop.f32.mrf.mxu2 }
 0x2ac   :  { %v728_v51 = vadd.f32 %v727_v49, %v633_v32 }
 0x2ae   :  { %v791_v52 = vmul.f32 0.2, %v728_v51  ;;  %vm775_vm1 = vcmp.gt.f32.partialorder %v728_v51, 0.0 }
 0x2b0   :  { %v807_v56 = vsel %vm775_vm1, %v728_v51, %v791_v52 }
 0x2b1   :  { %v919_v61 = vmul.f32 %v842_v59, %v807_v56 }
 0x2b3   :  { %v730_v53 = vpop.f32.mrf.mxu2 }
 0x2b4   :  { %v731_v54 = vadd.f32 %v730_v53, %v638_v36 }
 0x2b6   :  { %vm776_vm2 = vcmp.gt.f32.partialorder %v731_v54, 0.0  ;;  %v792_v57 = vmul.f32 0.2, %v731_v54 }
 0x2b8   :  { %v808_v60 = vsel %vm776_vm2, %v731_v54, %v792_v57 }
 0x2b9   :  { %v920_v62 = vmul.f32 %v847_v58, %v808_v60 }
 0x2bb   :  { %v935_v63 = vadd.f32 %v920_v62, %v919_v61  ;;  %v733_v0 = vpop.f32.mrf.mxu2  ;;  %v892_v62 = vpop.permute.xlu1 %891 }
 0x2bc   :  { %v734_v1 = vadd.f32 %v733_v0, %v643_v34 }
 0x2be   :  { %vm777_vm3 = vcmp.gt.f32.partialorder %v734_v1, 0.0  ;;  %v793_v2 = vmul.f32 0.2, %v734_v1 }
 0x2c0   :  { %v809_v6 = vsel %vm777_vm3, %v734_v1, %v793_v2 }
 0x2c1   :  { %v921_v7 = vmul.f32 %v852_v4, %v809_v6 }
 0x2c3   :  { %v936_v8 = vadd.f32 %v935_v63, %v921_v7  ;;  %v736_v9 = vpop.f32.mrf.mxu2  ;;  %v772_v7 = vpop.f32.mrf.mxu3 }
 0x2c4   :  { %v737_v10 = vadd.f32 %v736_v9, %v648_v40 }
 0x2c6   :  { %vm778_vm4 = vcmp.gt.f32.partialorder %v737_v10, 0.0  ;;  %v794_v12 = vmul.f32 0.2, %v737_v10 }
 0x2c8   :  { %v810_v14 = vsel %vm778_vm4, %v737_v10, %v794_v12  ;;  %v897_v10 = vpop.permute.xlu2 %896 }
 0x2c9   :  { %v922_v15 = vmul.f32 %v857_v13, %v810_v14 }
 0x2cb   :  { %v937_v11 = vadd.f32 %v936_v8, %v922_v15  ;;  %v739_v16 = vpop.f32.mrf.mxu2 }
 0x2cc   :  { %v740_v22 = vadd.f32 %v739_v16, %v653_v43 }
 0x2ce   :  { %v795_v27 = vmul.f32 0.2, %v740_v22  ;;  %vm779_vm5 = vcmp.gt.f32.partialorder %v740_v22, 0.0 }
 0x2d0   :  { %v811_v32 = vsel %vm779_vm5, %v740_v22, %v795_v27  ;;  %v912_v27 = vpop.permute.xlu2 %911 }
 0x2d1   :  { %v923_v43 = vmul.f32 %v862_v21, %v811_v32 }
 0x2d3   :  { %v742_v17 = vpop.f32.mrf.mxu2  ;;  %v938_v56 = vadd.f32 %v937_v11, %v923_v43  ;;  %v773_v11 = vadd.f32 %v772_v7, %v1618_v55 }
 0x2d4   :  { %v743_v24 = vadd.f32 %v742_v17, %v658_v42 }
 0x2d5   :  { %v806_v21 = vmul.f32 0.2, %v773_v11  ;;  %vm790_vm15 = vcmp.gt.f32.partialorder %v773_v11, 0.0 }
 0x2d6   :  { %v796_v29 = vmul.f32 0.2, %v743_v24  ;;  %vm780_vm6 = vcmp.gt.f32.partialorder %v743_v24, 0.0 }
 0x2d8   :  { %v812_v36 = vsel %vm780_vm6, %v743_v24, %v796_v29 }
 0x2d9   :  { %v924_v52 = vmul.f32 %v867_v23, %v812_v36 }
 0x2db   :  { %v745_v5 = vpop.f32.mrf.mxu2  ;;  %v939_v60 = vadd.f32 %v938_v56, %v924_v52 }
 0x2dc   :  { %v746_v28 = vadd.f32 %v745_v5, %v663_v45 }
 0x2de   :  { %v797_v33 = vmul.f32 0.2, %v746_v28  ;;  %vm781_vm7 = vcmp.gt.f32.partialorder %v746_v28, 0.0 }
 0x2e0   :  { %v813_v49 = vsel %vm781_vm7, %v746_v28, %v797_v33  ;;  %v822_v28 = vsel %vm790_vm15, %v773_v11, %v806_v21 }
 0x2e1   :  { %v925_v57 = vmul.f32 %v872_v26, %v813_v49 }
 0x2e3   :  { %v748_v18 = vpop.f32.mrf.mxu2  ;;  %v940_v0 = vadd.f32 %v939_v60, %v925_v57 }
 0x2e4   :  { %v749_v30 = vadd.f32 %v748_v18, %v668_v46  ;;  %v887_v46 = vpop.permute.xlu0 %886 }
 0x2e6   :  { %v798_v38 = vmul.f32 0.2, %v749_v30  ;;  %vm782_vm8 = vcmp.gt.f32.partialorder %v749_v30, 0.0 }
 0x2e8   :  { %v814_v53 = vsel %vm782_vm8, %v749_v30, %v798_v38 }
 0x2e9   :  { %v926_v61 = vmul.f32 %v877_v31, %v814_v53 }
 0x2eb   :  { %v751_v3 = vpop.f32.mrf.mxu2  ;;  %v941_v8 = vadd.f32 %v940_v0, %v926_v61 }
 0x2ec   :  { %v752_v34 = vadd.f32 %v751_v3, %v673_v41  ;;  %v902_v15 = vpop.permute.xlu0 %901 }
 0x2ee   :  { %v799_v51 = vmul.f32 0.2, %v752_v34  ;;  %vm783_vm9 = vcmp.gt.f32.partialorder %v752_v34, 0.0 }
 0x2f0   :  { %v815_v58 = vsel %vm783_vm9, %v752_v34, %v799_v51 }
 0x2f1   :  { %v927_v1 = vmul.f32 %v882_v44, %v815_v58 }
 0x2f3   :  { %v754_v19 = vpop.f32.mrf.mxu2  ;;  %v942_v13 = vadd.f32 %v941_v8, %v927_v1 }
 0x2f4   :  { %v755_v40 = vadd.f32 %v754_v19, %v1606_v47  ;;  %v917_v31 = vpop.permute.xlu0 %916 }
 0x2f5   :  { %v934_v32 = vmul.f32 %v917_v31, %v822_v28 }
 0x2f6   :  { %v800_v54 = vmul.f32 0.2, %v755_v40  ;;  %vm784_vm10 = vcmp.gt.f32.partialorder %v755_v40, 0.0 }
 0x2f8   :  { %v816_v63 = vsel %vm784_vm10, %v755_v40, %v800_v54 }
 0x2f9   :  { %v928_v9 = vmul.f32 %v887_v46, %v816_v63 }
 0x2fb   :  { %v757_v20 = vpop.f32.mrf.mxu2  ;;  %v943_v17 = vadd.f32 %v942_v13, %v928_v9 }
 0x2fc   :  { %v758_v45 = vadd.f32 %v757_v20, %v1610_v48  ;;  %v907_v20 = vpop.permute.xlu1 %906 }
 0x2fe   :  { %v801_v47 = vmul.f32 0.2, %v758_v45  ;;  %vm785_vm11 = vcmp.gt.f32.partialorder %v758_v45, 0.0 }
 0x300   :  { %v817_v4 = vsel %vm785_vm11, %v758_v45, %v801_v47 }
 0x301   :  { %v929_v14 = vmul.f32 %v892_v62, %v817_v4 }
 0x303   :  { %v760_v25 = vpop.f32.mrf.mxu2  ;;  %v944_v3 = vadd.f32 %v943_v17, %v929_v14 }
 0x304   :  { %v761_v41 = vadd.f32 %v760_v25, %v1608_v39 }
 0x306   :  { %v802_v48 = vmul.f32 0.2, %v761_v41  ;;  %vm786_vm12 = vcmp.gt.f32.partialorder %v761_v41, 0.0 }
 0x30b   :  { %v763_v42 = vpop.f32.mrf.mxu2 }
 0x30c   :  { %v764_v59 = vadd.f32 %v763_v42, %v1612_v37  ;;  %v818_v37 = vsel %vm786_vm12, %v761_v41, %v802_v48 }
 0x30d   :  { %v930_v5 = vmul.f32 %v897_v10, %v818_v37 }
 0x30e   :  { %v803_v6 = vmul.f32 0.2, %v764_v59  ;;  %vm787_vm13 = vcmp.gt.f32.partialorder %v764_v59, 0.0 }
 0x30f   :  { %v945_v23 = vadd.f32 %v944_v3, %v930_v5 }
 0x310   :  { %v819_v16 = vsel %vm787_vm13, %v764_v59, %v803_v6 }
 0x311   :  { %v931_v19 = vmul.f32 %v902_v15, %v819_v16 }
 0x313   :  { %v766_v2 = vpop.f32.mrf.mxu2  ;;  %v946_v26 = vadd.f32 %v945_v23, %v931_v19 }
 0x314   :  { %v767_v39 = vadd.f32 %v766_v2, %v1616_v35 }
 0x316   :  { %v804_v12 = vmul.f32 0.2, %v767_v39  ;;  %vm788_vm14 = vcmp.gt.f32.partialorder %v767_v39, 0.0 }
 0x318   :  { %v820_v18 = vsel %vm788_vm14, %v767_v39, %v804_v12 }
 0x319   :  { %v932_v24 = vmul.f32 %v907_v20, %v820_v18 }
 0x31b   :  { %v769_v35 = vpop.f32.mrf.mxu2  ;;  %v947_v29 = vadd.f32 %v946_v26, %v932_v24 }
 0x31c   :  { %v770_v22 = vadd.f32 %v769_v35, %v1614_v50  ;;  %v960_v50 = vpop.permute.xlu1 %959 }
 0x31d   :  { %v962_v44 = vperm.slane %v960_v50, 0 }
 0x31e   :  { %vm789_vm0 = vcmp.gt.f32.partialorder %v770_v22, 0.0  ;;  %v805_v25 = vmul.f32 0.2, %v770_v22 }
 0x320   :  { %v821_v55 = vsel %vm789_vm0, %v770_v22, %v805_v25 }
 0x321   :  { %v933_v30 = vmul.f32 %v912_v27, %v821_v55 }
 0x323   :  { %v948_v33 = vadd.f32 %v947_v29, %v933_v30 }
 0x325   :  { %v949_v34 = vadd.f32 %v948_v33, %v934_v32 }
 0x327   :  { %v950_v36 = vrot.slane %v949_v34, 4 }
 0x329   :  { %v951_v38 = vadd.f32 %v950_v36, %v949_v34 }
 0x32b   :  { %v952_v40 = vrot.slane %v951_v38, 2 }
 0x32d   :  { %v953_v43 = vadd.f32 %v952_v40, %v951_v38 }
 0x32f   :  { %v954_v42 = vrot.slane %v953_v43, 1 }
 0x331   :  { %v955_v49 = vadd.f32 %v954_v42, %v953_v43 }
 0x333   :  { %v963_v51 = vadd.f32 %v962_v44, %v955_v49 }
 0x335   :  { %964 = vst [vmem:[#allocation3] sm:$0x1] %v963_v51 }
 0x336   :  { %975 = dma.vmem_to_hbm [thread:$0]  %s971_s14, 16, %s973_s17, [#allocation4]  }
 0x337   :  { %1090 = dma.done.wait [#allocation4], 16  }
 0x338   :  { %1091 = vsyncadd [#allocation4], 4294967280 }
 0x339   :  { %980 = vsyncpa [#allocation4], 1 }

</bundles_post_ra>
